<compile_context>
chip_gen: v5e
topology: v5e:2x2
jax: 0.10.0
libtpu: 0.0.40
codegen_flags: <defaults>
</compile_context>

<pallas_src>
import functools

import jax
import jax.numpy as jnp
from jax import lax
from jax.experimental import pallas as pl
from jax.experimental.pallas import tpu as pltpu


_ROWS_PER_STORE = 8  # sublane-aligned store granule (f32 vreg sublane count)


def _round_up(x, m):
    return ((x + m - 1) // m) * m


def _vmem_capacity_bytes():
    """Physical VMEM of the current TPU generation (fallback: 64 MiB = v7x)."""
    try:
        return int(pltpu.get_tpu_info().vmem_capacity_bytes)
    except Exception:
        return 64 * 1024 * 1024


# ---------------------------------------------------------------------------
# Path A: VMEM-resident table, batched 8-row gather.
# ---------------------------------------------------------------------------
def _resident_gather_kernel(idx_ref, table_hbm, out_ref, table_vmem, load_sem,
                            *, tile_n):
    """
    idx_ref    : SMEM int32[n_pad]   scalar-prefetched flat row indices
    table_hbm  : ANY  f[R, C]        channel-last feature table (stays in HBM)
    out_ref    : VMEM f[tile_n, C]   dense output slab for this grid step
    table_vmem : VMEM f[R, C]        resident copy of the table (scratch)
    load_sem   : DMA semaphore
    """
    # Load the table exactly once.  Grid axis is "arbitrary" (sequential), so
    # the scratch copy stays valid for every later step; single-buffered, i.e.
    # the table costs 1x its size in VMEM instead of 2x for a constant-index
    # pipelined BlockSpec.
    @pl.when(pl.program_id(0) == 0)
    def _():
        cp = pltpu.make_async_copy(table_hbm, table_vmem, load_sem)
        cp.start()
        cp.wait()

    base = pl.program_id(0) * tile_n
    n_chunks = tile_n // _ROWS_PER_STORE

    def body(c, carry):
        start = c * _ROWS_PER_STORE
        # Gather 8 rows with (1, C) dynamic-offset *loads* (3 load slots/cycle,
        # plenty of slack) and combine them in registers ...
        rows = [table_vmem[pl.ds(idx_ref[base + start + r], 1), :]
                for r in range(_ROWS_PER_STORE)]
        block = jnp.concatenate(rows, axis=0)                     # (8, C)
        # ... so the write side is ONE sublane-aligned unmasked store instead
        # of 8 masked single-sublane stores with XLU sublane shifts.
        off = pl.multiple_of(start, _ROWS_PER_STORE)
        out_ref[pl.ds(off, _ROWS_PER_STORE), :] = block
        return carry

    # TODO(synk): for C < 128, pack 128//C gathered rows into one 128-lane
    # output row (lane-dense writeback) instead of lane-masked (8, C) slabs.
    lax.fori_loop(0, n_chunks, body, 0, unroll=8)


def _resident_gather(flat_idx, flat_feats, n_tiles, tile_n, vmem_limit):
    n_pad, = flat_idx.shape
    R, C = flat_feats.shape
    grid_spec = pltpu.PrefetchScalarGridSpec(
        num_scalar_prefetch=1,
        grid=(n_tiles,),
        in_specs=[pl.BlockSpec(memory_space=pl.ANY)],   # table left in HBM
        out_specs=pl.BlockSpec((tile_n, C), lambda i, idx_ref: (i, 0)),
        scratch_shapes=[
            pltpu.VMEM((R, C), flat_feats.dtype),       # resident table copy
            pltpu.SemaphoreType.DMA,                    # one-time load sem
        ],
    )
    return pl.pallas_call(
        functools.partial(_resident_gather_kernel, tile_n=tile_n),
        out_shape=jax.ShapeDtypeStruct((n_pad, C), flat_feats.dtype),
        grid_spec=grid_spec,
        compiler_params=pltpu.CompilerParams(
            # Sequential grid: the one-time table load at step 0 must precede
            # all other steps, and duplicating the resident table per-core is
            # a net loss for megacore anyway at these tile counts.
            dimension_semantics=("arbitrary",),
            vmem_limit_bytes=vmem_limit,
        ),
    )(flat_idx, flat_feats)


# ---------------------------------------------------------------------------
# Path B: HBM DMA-gather with a ring of outstanding row fetches.
# ---------------------------------------------------------------------------
def _dma_gather_kernel(idx_ref, table_hbm, out_ref, stage, sems,
                       *, tile_n, n_ring):
    """
    idx_ref   : SMEM int32[n_pad]
    table_hbm : ANY  f[R, C]       (only the gathered rows are fetched)
    out_ref   : VMEM f[tile_n, C]
    stage     : VMEM f[tile_n, C]  staging buffer for the row DMAs
    sems      : DMA semaphores [n_ring]
    """
    base = pl.program_id(0) * tile_n

    def row_copy(j):
        row = idx_ref[base + j]
        slot = j % n_ring
        return pltpu.make_async_copy(table_hbm.at[row], stage.at[j],
                                     sems.at[slot])

    # Prime the ring of outstanding row fetches.
    def prime(j, carry):
        row_copy(j).start()
        return carry
    lax.fori_loop(0, n_ring, prime, 0)

    # Drain: wait on the oldest fetch, immediately issue the next one so that
    # n_ring DMAs stay in flight.
    def body(j, carry):
        row_copy(j).wait()

        @pl.when(j + n_ring < tile_n)
        def _():
            row_copy(j + n_ring).start()
        return carry
    lax.fori_loop(0, tile_n, body, 0)

    out_ref[...] = stage[...]


def _dma_gather(flat_idx, flat_feats, n_tiles, tile_n, n_ring):
    n_pad, = flat_idx.shape
    R, C = flat_feats.shape
    grid_spec = pltpu.PrefetchScalarGridSpec(
        num_scalar_prefetch=1,
        grid=(n_tiles,),
        in_specs=[pl.BlockSpec(memory_space=pl.ANY)],
        out_specs=pl.BlockSpec((tile_n, C), lambda i, idx_ref: (i, 0)),
        scratch_shapes=[
            pltpu.VMEM((tile_n, C), flat_feats.dtype),
            pltpu.SemaphoreType.DMA((n_ring,)),
        ],
    )
    return pl.pallas_call(
        functools.partial(_dma_gather_kernel, tile_n=tile_n, n_ring=n_ring),
        out_shape=jax.ShapeDtypeStruct((n_pad, C), flat_feats.dtype),
        grid_spec=grid_spec,
        compiler_params=pltpu.CompilerParams(
            # Tiles are fully independent here -> shard across TensorCores
            # when there is more than one tile.
            dimension_semantics=("parallel",) if n_tiles > 1 else ("arbitrary",),
        ),
    )(flat_idx, flat_feats)


# ---------------------------------------------------------------------------
# Wrapper (forward pass of SparseExtraction).
# ---------------------------------------------------------------------------
def sparse_extraction(spatial_features_2d, voxel_coords, *, tile_n=512,
                      channels_last=False, out_dtype=None, gather_mode="auto"):
    """
    Args:
      spatial_features_2d: (B, C, H, W) float array (NCHW, like PyTorch), or
                           (B, H, W, C) if channels_last=True.
      voxel_coords:        (N, 4) int array, columns [b, z, y, x] (z unused).
      out_dtype:           optional narrower dtype (e.g. bf16), fused into the
                           channel-last transpose to halve table VMEM/HBM use.
      gather_mode:         "auto" | "resident" | "dma".
    Returns:
      point_features: (N, C).
    """
    if channels_last:
        B, H, W, C = spatial_features_2d.shape
        nhwc = spatial_features_2d
    else:
        B, C, H, W = spatial_features_2d.shape
        # TODO(synk): produce the BEV map channel-last upstream (or fuse this
        # transpose into its producer) to avoid a full feature-map HBM round
        # trip before the gather.
        nhwc = jnp.transpose(spatial_features_2d, (0, 2, 3, 1))
    if out_dtype is not None:
        nhwc = nhwc.astype(out_dtype)   # fused with the transpose by XLA

    R = B * H * W
    flat_feats = nhwc.reshape(R, C)     # channel-last, lane-dense rows

    N = voxel_coords.shape[0]
    if N == 0:
        return jnp.zeros((0, C), dtype=flat_feats.dtype)

    vc = voxel_coords.astype(jnp.int32)
    b, y, x = vc[:, 0], vc[:, 2], vc[:, 3]
    # Match torch advanced-indexing semantics for negative (wrap-around)
    # indices, then clamp so padded / invalid rows can never address out of
    # range (Pallas does not bounds-check VMEM indexing / DMA addressing).
    b = jnp.where(b < 0, b + B, b)
    y = jnp.where(y < 0, y + H, y)
    x = jnp.where(x < 0, x + W, x)
    flat_idx = jnp.clip((b * H + y) * W + x, 0, R - 1)

    # Tile sizing: large tiles amortize the ~0.35us per-grid-step overhead,
    # but never pad past the next multiple of 8 rows of real work.
    tile_n = max(_ROWS_PER_STORE,
                 min(_round_up(tile_n, _ROWS_PER_STORE),
                     _round_up(N, _ROWS_PER_STORE)))
    n_tiles = pl.cdiv(N, tile_n)
    n_pad = n_tiles * tile_n
    if n_pad != N:
        flat_idx = jnp.pad(flat_idx, (0, n_pad - N))
    # TODO(synk): for N >~ 1e5 the scalar-prefetched int32[n_pad] SMEM footprint
    # (next_pow2(4*n_pad) bytes) gets large; switch the index feed to a
    # per-tile blocked SMEM input so SMEM stays O(tile_n).

    # Per-generation VMEM budget (v5e/v6e: 128 MiB, v7x: 64 MiB), keeping ~25%
    # headroom for compiler scratch and the pipelined output blocks.
    itemsize = jnp.dtype(flat_feats.dtype).itemsize
    table_bytes = R * C * itemsize
    out_tile_bytes = tile_n * C * itemsize
    usable_vmem = (_vmem_capacity_bytes() * 3) // 4
    resident_need = table_bytes + 2 * out_tile_bytes + (1 << 20)

    if gather_mode == "auto":
        very_sparse = n_pad * 8 < R   # gathered bytes << table bytes
        gather_mode = "dma" if (resident_need > usable_vmem or very_sparse) \
            else "resident"

    if gather_mode == "resident":
        vmem_limit = int(min(usable_vmem,
                             max(resident_need + (4 << 20), 32 << 20)))
        out = _resident_gather(flat_idx, flat_feats, n_tiles, tile_n, vmem_limit)
    elif gather_mode == "dma":
        n_ring = min(8, tile_n)
        out = _dma_gather(flat_idx, flat_feats, n_tiles, tile_n, n_ring)
    else:
        raise ValueError(f"unknown gather_mode: {gather_mode!r}")

    return out[:N]


if __name__ == "__main__":
    key = jax.random.PRNGKey(0)
    k_feat, k_b, k_z, k_y, k_x = jax.random.split(key, 5)

    B, C, H, W = 2, 32, 16, 16
    N = 64  # number of sparse voxels

    spatial_features_2d = jax.random.normal(k_feat, (B, C, H, W),
                                            dtype=jnp.float32)
    voxel_coords = jnp.stack(
        [
            jax.random.randint(k_b, (N,), 0, B, dtype=jnp.int32),   # batch
            jax.random.randint(k_z, (N,), 0, 4, dtype=jnp.int32),   # z (unused)
            jax.random.randint(k_y, (N,), 0, H, dtype=jnp.int32),   # y
            jax.random.randint(k_x, (N,), 0, W, dtype=jnp.int32),   # x
        ],
        axis=1,
    )

    # Reference: spatial_features.permute(0, 2, 3, 1)[b, y, x]
    nhwc = jnp.transpose(spatial_features_2d, (0, 2, 3, 1))
    ref = nhwc[voxel_coords[:, 0], voxel_coords[:, 2], voxel_coords[:, 3]]

    for mode in ("resident", "dma"):
        pf = sparse_extraction(spatial_features_2d, voxel_coords,
                               gather_mode=mode)
        pf = jax.block_until_ready(pf)
        assert pf.shape == (N, C)
        assert pf.dtype == spatial_features_2d.dtype
        assert jnp.allclose(pf, ref), f"mismatch vs reference gather ({mode})"

    print("KERNEL_OK")
</pallas_src>

<mosaic_0001>
module attributes {stable_mosaic.version = 11 : i64} {
  func.func @_resident_gather_kernel(%arg0: i32, %arg1: memref<64xi32, #tpu.memory_space<smem>>, %arg2: memref<512x32xf32, #tpu.memory_space<any>>, %arg3: memref<64x32xf32, #tpu.memory_space<vmem>>, %arg4: memref<512x32xf32, #tpu.memory_space<vmem>>, %arg5: memref<!tpu.dma_semaphore, #tpu.memory_space<semaphore_mem>>) attributes {dimension_semantics = [#tpu.dimension_semantics<arbitrary>], iteration_bounds = array<i64: 1>, scalar_prefetch = 1 : i64, scratch_operands = 2 : i64, tpu.core_type = #tpu.core_type<tc>, window_params = [{}, {transform_indices = @transform_1, window_bounds = array<i64: 64, 32>}]} {
    %c0_i32 = arith.constant 0 : i32
    %0 = arith.cmpi eq, %arg0, %c0_i32 : i32
    %1 = arith.extui %0 : i1 to i32
    %c0_i32_0 = arith.constant 0 : i32
    %2 = arith.cmpi ne, %1, %c0_i32_0 : i32
    scf.if %2 {
      tpu.enqueue_dma source(%arg2 : memref<512x32xf32, #tpu.memory_space<any>>) target(%arg4 : memref<512x32xf32, #tpu.memory_space<vmem>>) target_semaphore(%arg5 : memref<!tpu.dma_semaphore, #tpu.memory_space<semaphore_mem>>)
      tpu.wait_dma2 semaphore(%arg5 : memref<!tpu.dma_semaphore, #tpu.memory_space<semaphore_mem>>) src(%arg2 : memref<512x32xf32, #tpu.memory_space<any>>) dst(%arg4 : memref<512x32xf32, #tpu.memory_space<vmem>>)
    } else {
    }
    %c64_i32 = arith.constant 64 : i32
    %3 = arith.muli %arg0, %c64_i32 : i32
    %c0_i32_1 = arith.constant 0 : i32
    %c8_i32 = arith.constant 8 : i32
    %4 = arith.muli %c0_i32_1, %c8_i32 : i32
    %5 = arith.addi %3, %4 : i32
    %c0_i32_2 = arith.constant 0 : i32
    %6 = arith.addi %5, %c0_i32_2 : i32
    %7 = arith.index_cast %6 : i32 to index
    %8 = memref.load %arg1[%7] : memref<64xi32, #tpu.memory_space<smem>>
    %9 = arith.index_cast %8 : i32 to index
    %c0 = arith.constant 0 : index
    %10 = vector.load %arg4[%9, %c0] : memref<512x32xf32, #tpu.memory_space<vmem>>, vector<1x32xf32>
    %11 = arith.addi %3, %4 : i32
    %c1_i32 = arith.constant 1 : i32
    %12 = arith.addi %11, %c1_i32 : i32
    %13 = arith.index_cast %12 : i32 to index
    %14 = memref.load %arg1[%13] : memref<64xi32, #tpu.memory_space<smem>>
    %15 = arith.index_cast %14 : i32 to index
    %c0_3 = arith.constant 0 : index
    %16 = vector.load %arg4[%15, %c0_3] : memref<512x32xf32, #tpu.memory_space<vmem>>, vector<1x32xf32>
    %17 = arith.addi %3, %4 : i32
    %c2_i32 = arith.constant 2 : i32
    %18 = arith.addi %17, %c2_i32 : i32
    %19 = arith.index_cast %18 : i32 to index
    %20 = memref.load %arg1[%19] : memref<64xi32, #tpu.memory_space<smem>>
    %21 = arith.index_cast %20 : i32 to index
    %c0_4 = arith.constant 0 : index
    %22 = vector.load %arg4[%21, %c0_4] : memref<512x32xf32, #tpu.memory_space<vmem>>, vector<1x32xf32>
    %23 = arith.addi %3, %4 : i32
    %c3_i32 = arith.constant 3 : i32
    %24 = arith.addi %23, %c3_i32 : i32
    %25 = arith.index_cast %24 : i32 to index
    %26 = memref.load %arg1[%25] : memref<64xi32, #tpu.memory_space<smem>>
    %27 = arith.index_cast %26 : i32 to index
    %c0_5 = arith.constant 0 : index
    %28 = vector.load %arg4[%27, %c0_5] : memref<512x32xf32, #tpu.memory_space<vmem>>, vector<1x32xf32>
    %29 = arith.addi %3, %4 : i32
    %c4_i32 = arith.constant 4 : i32
    %30 = arith.addi %29, %c4_i32 : i32
    %31 = arith.index_cast %30 : i32 to index
    %32 = memref.load %arg1[%31] : memref<64xi32, #tpu.memory_space<smem>>
    %33 = arith.index_cast %32 : i32 to index
    %c0_6 = arith.constant 0 : index
    %34 = vector.load %arg4[%33, %c0_6] : memref<512x32xf32, #tpu.memory_space<vmem>>, vector<1x32xf32>
    %35 = arith.addi %3, %4 : i32
    %c5_i32 = arith.constant 5 : i32
    %36 = arith.addi %35, %c5_i32 : i32
    %37 = arith.index_cast %36 : i32 to index
    %38 = memref.load %arg1[%37] : memref<64xi32, #tpu.memory_space<smem>>
    %39 = arith.index_cast %38 : i32 to index
    %c0_7 = arith.constant 0 : index
    %40 = vector.load %arg4[%39, %c0_7] : memref<512x32xf32, #tpu.memory_space<vmem>>, vector<1x32xf32>
    %41 = arith.addi %3, %4 : i32
    %c6_i32 = arith.constant 6 : i32
    %42 = arith.addi %41, %c6_i32 : i32
    %43 = arith.index_cast %42 : i32 to index
    %44 = memref.load %arg1[%43] : memref<64xi32, #tpu.memory_space<smem>>
    %45 = arith.index_cast %44 : i32 to index
    %c0_8 = arith.constant 0 : index
    %46 = vector.load %arg4[%45, %c0_8] : memref<512x32xf32, #tpu.memory_space<vmem>>, vector<1x32xf32>
    %47 = arith.addi %3, %4 : i32
    %c7_i32 = arith.constant 7 : i32
    %48 = arith.addi %47, %c7_i32 : i32
    %49 = arith.index_cast %48 : i32 to index
    %50 = memref.load %arg1[%49] : memref<64xi32, #tpu.memory_space<smem>>
    %51 = arith.index_cast %50 : i32 to index
    %c0_9 = arith.constant 0 : index
    %52 = vector.load %arg4[%51, %c0_9] : memref<512x32xf32, #tpu.memory_space<vmem>>, vector<1x32xf32>
    %53 = tpu.concatenate %10, %16, %22, %28, %34, %40, %46, %52 in 0 : vector<1x32xf32>, vector<1x32xf32>, vector<1x32xf32>, vector<1x32xf32>, vector<1x32xf32>, vector<1x32xf32>, vector<1x32xf32>, vector<1x32xf32> -> vector<8x32xf32>
    %54 = tpu.assume_multiple %4, 8 : i32
    %55 = arith.index_cast %54 : i32 to index
    %c0_10 = arith.constant 0 : index
    %56 = vector.load %arg3[%55, %c0_10] : memref<64x32xf32, #tpu.memory_space<vmem>>, vector<8x32xf32>
    tpu.vector_store %arg3[%55, %c0_10], %53 {strides = array<i32>} : memref<64x32xf32, #tpu.memory_space<vmem>>, vector<8x32xf32>,
    %c1_i32_11 = arith.constant 1 : i32
    %c8_i32_12 = arith.constant 8 : i32
    %57 = arith.muli %c1_i32_11, %c8_i32_12 : i32
    %58 = arith.addi %3, %57 : i32
    %c0_i32_13 = arith.constant 0 : i32
    %59 = arith.addi %58, %c0_i32_13 : i32
    %60 = arith.index_cast %59 : i32 to index
    %61 = memref.load %arg1[%60] : memref<64xi32, #tpu.memory_space<smem>>
    %62 = arith.index_cast %61 : i32 to index
    %c0_14 = arith.constant 0 : index
    %63 = vector.load %arg4[%62, %c0_14] : memref<512x32xf32, #tpu.memory_space<vmem>>, vector<1x32xf32>
    %64 = arith.addi %3, %57 : i32
    %c1_i32_15 = arith.constant 1 : i32
    %65 = arith.addi %64, %c1_i32_15 : i32
    %66 = arith.index_cast %65 : i32 to index
    %67 = memref.load %arg1[%66] : memref<64xi32, #tpu.memory_space<smem>>
    %68 = arith.index_cast %67 : i32 to index
    %c0_16 = arith.constant 0 : index
    %69 = vector.load %arg4[%68, %c0_16] : memref<512x32xf32, #tpu.memory_space<vmem>>, vector<1x32xf32>
    %70 = arith.addi %3, %57 : i32
    %c2_i32_17 = arith.constant 2 : i32
    %71 = arith.addi %70, %c2_i32_17 : i32
    %72 = arith.index_cast %71 : i32 to index
    %73 = memref.load %arg1[%72] : memref<64xi32, #tpu.memory_space<smem>>
    %74 = arith.index_cast %73 : i32 to index
    %c0_18 = arith.constant 0 : index
    %75 = vector.load %arg4[%74, %c0_18] : memref<512x32xf32, #tpu.memory_space<vmem>>, vector<1x32xf32>
    %76 = arith.addi %3, %57 : i32
    %c3_i32_19 = arith.constant 3 : i32
    %77 = arith.addi %76, %c3_i32_19 : i32
    %78 = arith.index_cast %77 : i32 to index
    %79 = memref.load %arg1[%78] : memref<64xi32, #tpu.memory_space<smem>>
    %80 = arith.index_cast %79 : i32 to index
    %c0_20 = arith.constant 0 : index
    %81 = vector.load %arg4[%80, %c0_20] : memref<512x32xf32, #tpu.memory_space<vmem>>, vector<1x32xf32>
    %82 = arith.addi %3, %57 : i32
    %c4_i32_21 = arith.constant 4 : i32
    %83 = arith.addi %82, %c4_i32_21 : i32
    %84 = arith.index_cast %83 : i32 to index
    %85 = memref.load %arg1[%84] : memref<64xi32, #tpu.memory_space<smem>>
    %86 = arith.index_cast %85 : i32 to index
    %c0_22 = arith.constant 0 : index
    %87 = vector.load %arg4[%86, %c0_22] : memref<512x32xf32, #tpu.memory_space<vmem>>, vector<1x32xf32>
    %88 = arith.addi %3, %57 : i32
    %c5_i32_23 = arith.constant 5 : i32
    %89 = arith.addi %88, %c5_i32_23 : i32
    %90 = arith.index_cast %89 : i32 to index
    %91 = memref.load %arg1[%90] : memref<64xi32, #tpu.memory_space<smem>>
    %92 = arith.index_cast %91 : i32 to index
    %c0_24 = arith.constant 0 : index
    %93 = vector.load %arg4[%92, %c0_24] : memref<512x32xf32, #tpu.memory_space<vmem>>, vector<1x32xf32>
    %94 = arith.addi %3, %57 : i32
    %c6_i32_25 = arith.constant 6 : i32
    %95 = arith.addi %94, %c6_i32_25 : i32
    %96 = arith.index_cast %95 : i32 to index
    %97 = memref.load %arg1[%96] : memref<64xi32, #tpu.memory_space<smem>>
    %98 = arith.index_cast %97 : i32 to index
    %c0_26 = arith.constant 0 : index
    %99 = vector.load %arg4[%98, %c0_26] : memref<512x32xf32, #tpu.memory_space<vmem>>, vector<1x32xf32>
    %100 = arith.addi %3, %57 : i32
    %c7_i32_27 = arith.constant 7 : i32
    %101 = arith.addi %100, %c7_i32_27 : i32
    %102 = arith.index_cast %101 : i32 to index
    %103 = memref.load %arg1[%102] : memref<64xi32, #tpu.memory_space<smem>>
    %104 = arith.index_cast %103 : i32 to index
    %c0_28 = arith.constant 0 : index
    %105 = vector.load %arg4[%104, %c0_28] : memref<512x32xf32, #tpu.memory_space<vmem>>, vector<1x32xf32>
    %106 = tpu.concatenate %63, %69, %75, %81, %87, %93, %99, %105 in 0 : vector<1x32xf32>, vector<1x32xf32>, vector<1x32xf32>, vector<1x32xf32>, vector<1x32xf32>, vector<1x32xf32>, vector<1x32xf32>, vector<1x32xf32> -> vector<8x32xf32>
    %107 = tpu.assume_multiple %57, 8 : i32
    %108 = arith.index_cast %107 : i32 to index
    %c0_29 = arith.constant 0 : index
    %109 = vector.load %arg3[%108, %c0_29] : memref<64x32xf32, #tpu.memory_space<vmem>>, vector<8x32xf32>
    tpu.vector_store %arg3[%108, %c0_29], %106 {strides = array<i32>} : memref<64x32xf32, #tpu.memory_space<vmem>>, vector<8x32xf32>,
    %c2_i32_30 = arith.constant 2 : i32
    %c8_i32_31 = arith.constant 8 : i32
    %110 = arith.muli %c2_i32_30, %c8_i32_31 : i32
    %111 = arith.addi %3, %110 : i32
    %c0_i32_32 = arith.constant 0 : i32
    %112 = arith.addi %111, %c0_i32_32 : i32
    %113 = arith.index_cast %112 : i32 to index
    %114 = memref.load %arg1[%113] : memref<64xi32, #tpu.memory_space<smem>>
    %115 = arith.index_cast %114 : i32 to index
    %c0_33 = arith.constant 0 : index
    %116 = vector.load %arg4[%115, %c0_33] : memref<512x32xf32, #tpu.memory_space<vmem>>, vector<1x32xf32>
    %117 = arith.addi %3, %110 : i32
    %c1_i32_34 = arith.constant 1 : i32
    %118 = arith.addi %117, %c1_i32_34 : i32
    %119 = arith.index_cast %118 : i32 to index
    %120 = memref.load %arg1[%119] : memref<64xi32, #tpu.memory_space<smem>>
    %121 = arith.index_cast %120 : i32 to index
    %c0_35 = arith.constant 0 : index
    %122 = vector.load %arg4[%121, %c0_35] : memref<512x32xf32, #tpu.memory_space<vmem>>, vector<1x32xf32>
    %123 = arith.addi %3, %110 : i32
    %c2_i32_36 = arith.constant 2 : i32
    %124 = arith.addi %123, %c2_i32_36 : i32
    %125 = arith.index_cast %124 : i32 to index
    %126 = memref.load %arg1[%125] : memref<64xi32, #tpu.memory_space<smem>>
    %127 = arith.index_cast %126 : i32 to index
    %c0_37 = arith.constant 0 : index
    %128 = vector.load %arg4[%127, %c0_37] : memref<512x32xf32, #tpu.memory_space<vmem>>, vector<1x32xf32>
    %129 = arith.addi %3, %110 : i32
    %c3_i32_38 = arith.constant 3 : i32
    %130 = arith.addi %129, %c3_i32_38 : i32
    %131 = arith.index_cast %130 : i32 to index
    %132 = memref.load %arg1[%131] : memref<64xi32, #tpu.memory_space<smem>>
    %133 = arith.index_cast %132 : i32 to index
    %c0_39 = arith.constant 0 : index
    %134 = vector.load %arg4[%133, %c0_39] : memref<512x32xf32, #tpu.memory_space<vmem>>, vector<1x32xf32>
    %135 = arith.addi %3, %110 : i32
    %c4_i32_40 = arith.constant 4 : i32
    %136 = arith.addi %135, %c4_i32_40 : i32
    %137 = arith.index_cast %136 : i32 to index
    %138 = memref.load %arg1[%137] : memref<64xi32, #tpu.memory_space<smem>>
    %139 = arith.index_cast %138 : i32 to index
    %c0_41 = arith.constant 0 : index
    %140 = vector.load %arg4[%139, %c0_41] : memref<512x32xf32, #tpu.memory_space<vmem>>, vector<1x32xf32>
    %141 = arith.addi %3, %110 : i32
    %c5_i32_42 = arith.constant 5 : i32
    %142 = arith.addi %141, %c5_i32_42 : i32
    %143 = arith.index_cast %142 : i32 to index
    %144 = memref.load %arg1[%143] : memref<64xi32, #tpu.memory_space<smem>>
    %145 = arith.index_cast %144 : i32 to index
    %c0_43 = arith.constant 0 : index
    %146 = vector.load %arg4[%145, %c0_43] : memref<512x32xf32, #tpu.memory_space<vmem>>, vector<1x32xf32>
    %147 = arith.addi %3, %110 : i32
    %c6_i32_44 = arith.constant 6 : i32
    %148 = arith.addi %147, %c6_i32_44 : i32
    %149 = arith.index_cast %148 : i32 to index
    %150 = memref.load %arg1[%149] : memref<64xi32, #tpu.memory_space<smem>>
    %151 = arith.index_cast %150 : i32 to index
    %c0_45 = arith.constant 0 : index
    %152 = vector.load %arg4[%151, %c0_45] : memref<512x32xf32, #tpu.memory_space<vmem>>, vector<1x32xf32>
    %153 = arith.addi %3, %110 : i32
    %c7_i32_46 = arith.constant 7 : i32
    %154 = arith.addi %153, %c7_i32_46 : i32
    %155 = arith.index_cast %154 : i32 to index
    %156 = memref.load %arg1[%155] : memref<64xi32, #tpu.memory_space<smem>>
    %157 = arith.index_cast %156 : i32 to index
    %c0_47 = arith.constant 0 : index
    %158 = vector.load %arg4[%157, %c0_47] : memref<512x32xf32, #tpu.memory_space<vmem>>, vector<1x32xf32>
    %159 = tpu.concatenate %116, %122, %128, %134, %140, %146, %152, %158 in 0 : vector<1x32xf32>, vector<1x32xf32>, vector<1x32xf32>, vector<1x32xf32>, vector<1x32xf32>, vector<1x32xf32>, vector<1x32xf32>, vector<1x32xf32> -> vector<8x32xf32>
    %160 = tpu.assume_multiple %110, 8 : i32
    %161 = arith.index_cast %160 : i32 to index
    %c0_48 = arith.constant 0 : index
    %162 = vector.load %arg3[%161, %c0_48] : memref<64x32xf32, #tpu.memory_space<vmem>>, vector<8x32xf32>
    tpu.vector_store %arg3[%161, %c0_48], %159 {strides = array<i32>} : memref<64x32xf32, #tpu.memory_space<vmem>>, vector<8x32xf32>,
    %c3_i32_49 = arith.constant 3 : i32
    %c8_i32_50 = arith.constant 8 : i32
    %163 = arith.muli %c3_i32_49, %c8_i32_50 : i32
    %164 = arith.addi %3, %163 : i32
    %c0_i32_51 = arith.constant 0 : i32
    %165 = arith.addi %164, %c0_i32_51 : i32
    %166 = arith.index_cast %165 : i32 to index
    %167 = memref.load %arg1[%166] : memref<64xi32, #tpu.memory_space<smem>>
    %168 = arith.index_cast %167 : i32 to index
    %c0_52 = arith.constant 0 : index
    %169 = vector.load %arg4[%168, %c0_52] : memref<512x32xf32, #tpu.memory_space<vmem>>, vector<1x32xf32>
    %170 = arith.addi %3, %163 : i32
    %c1_i32_53 = arith.constant 1 : i32
    %171 = arith.addi %170, %c1_i32_53 : i32
    %172 = arith.index_cast %171 : i32 to index
    %173 = memref.load %arg1[%172] : memref<64xi32, #tpu.memory_space<smem>>
    %174 = arith.index_cast %173 : i32 to index
    %c0_54 = arith.constant 0 : index
    %175 = vector.load %arg4[%174, %c0_54] : memref<512x32xf32, #tpu.memory_space<vmem>>, vector<1x32xf32>
    %176 = arith.addi %3, %163 : i32
    %c2_i32_55 = arith.constant 2 : i32
    %177 = arith.addi %176, %c2_i32_55 : i32
    %178 = arith.index_cast %177 : i32 to index
    %179 = memref.load %arg1[%178] : memref<64xi32, #tpu.memory_space<smem>>
    %180 = arith.index_cast %179 : i32 to index
    %c0_56 = arith.constant 0 : index
    %181 = vector.load %arg4[%180, %c0_56] : memref<512x32xf32, #tpu.memory_space<vmem>>, vector<1x32xf32>
    %182 = arith.addi %3, %163 : i32
    %c3_i32_57 = arith.constant 3 : i32
    %183 = arith.addi %182, %c3_i32_57 : i32
    %184 = arith.index_cast %183 : i32 to index
    %185 = memref.load %arg1[%184] : memref<64xi32, #tpu.memory_space<smem>>
    %186 = arith.index_cast %185 : i32 to index
    %c0_58 = arith.constant 0 : index
    %187 = vector.load %arg4[%186, %c0_58] : memref<512x32xf32, #tpu.memory_space<vmem>>, vector<1x32xf32>
    %188 = arith.addi %3, %163 : i32
    %c4_i32_59 = arith.constant 4 : i32
    %189 = arith.addi %188, %c4_i32_59 : i32
    %190 = arith.index_cast %189 : i32 to index
    %191 = memref.load %arg1[%190] : memref<64xi32, #tpu.memory_space<smem>>
    %192 = arith.index_cast %191 : i32 to index
    %c0_60 = arith.constant 0 : index
    %193 = vector.load %arg4[%192, %c0_60] : memref<512x32xf32, #tpu.memory_space<vmem>>, vector<1x32xf32>
    %194 = arith.addi %3, %163 : i32
    %c5_i32_61 = arith.constant 5 : i32
    %195 = arith.addi %194, %c5_i32_61 : i32
    %196 = arith.index_cast %195 : i32 to index
    %197 = memref.load %arg1[%196] : memref<64xi32, #tpu.memory_space<smem>>
    %198 = arith.index_cast %197 : i32 to index
    %c0_62 = arith.constant 0 : index
    %199 = vector.load %arg4[%198, %c0_62] : memref<512x32xf32, #tpu.memory_space<vmem>>, vector<1x32xf32>
    %200 = arith.addi %3, %163 : i32
    %c6_i32_63 = arith.constant 6 : i32
    %201 = arith.addi %200, %c6_i32_63 : i32
    %202 = arith.index_cast %201 : i32 to index
    %203 = memref.load %arg1[%202] : memref<64xi32, #tpu.memory_space<smem>>
    %204 = arith.index_cast %203 : i32 to index
    %c0_64 = arith.constant 0 : index
    %205 = vector.load %arg4[%204, %c0_64] : memref<512x32xf32, #tpu.memory_space<vmem>>, vector<1x32xf32>
    %206 = arith.addi %3, %163 : i32
    %c7_i32_65 = arith.constant 7 : i32
    %207 = arith.addi %206, %c7_i32_65 : i32
    %208 = arith.index_cast %207 : i32 to index
    %209 = memref.load %arg1[%208] : memref<64xi32, #tpu.memory_space<smem>>
    %210 = arith.index_cast %209 : i32 to index
    %c0_66 = arith.constant 0 : index
    %211 = vector.load %arg4[%210, %c0_66] : memref<512x32xf32, #tpu.memory_space<vmem>>, vector<1x32xf32>
    %212 = tpu.concatenate %169, %175, %181, %187, %193, %199, %205, %211 in 0 : vector<1x32xf32>, vector<1x32xf32>, vector<1x32xf32>, vector<1x32xf32>, vector<1x32xf32>, vector<1x32xf32>, vector<1x32xf32>, vector<1x32xf32> -> vector<8x32xf32>
    %213 = tpu.assume_multiple %163, 8 : i32
    %214 = arith.index_cast %213 : i32 to index
    %c0_67 = arith.constant 0 : index
    %215 = vector.load %arg3[%214, %c0_67] : memref<64x32xf32, #tpu.memory_space<vmem>>, vector<8x32xf32>
    tpu.vector_store %arg3[%214, %c0_67], %212 {strides = array<i32>} : memref<64x32xf32, #tpu.memory_space<vmem>>, vector<8x32xf32>,
    %c4_i32_68 = arith.constant 4 : i32
    %c8_i32_69 = arith.constant 8 : i32
    %216 = arith.muli %c4_i32_68, %c8_i32_69 : i32
    %217 = arith.addi %3, %216 : i32
    %c0_i32_70 = arith.constant 0 : i32
    %218 = arith.addi %217, %c0_i32_70 : i32
    %219 = arith.index_cast %218 : i32 to index
    %220 = memref.load %arg1[%219] : memref<64xi32, #tpu.memory_space<smem>>
    %221 = arith.index_cast %220 : i32 to index
    %c0_71 = arith.constant 0 : index
    %222 = vector.load %arg4[%221, %c0_71] : memref<512x32xf32, #tpu.memory_space<vmem>>, vector<1x32xf32>
    %223 = arith.addi %3, %216 : i32
    %c1_i32_72 = arith.constant 1 : i32
    %224 = arith.addi %223, %c1_i32_72 : i32
    %225 = arith.index_cast %224 : i32 to index
    %226 = memref.load %arg1[%225] : memref<64xi32, #tpu.memory_space<smem>>
    %227 = arith.index_cast %226 : i32 to index
    %c0_73 = arith.constant 0 : index
    %228 = vector.load %arg4[%227, %c0_73] : memref<512x32xf32, #tpu.memory_space<vmem>>, vector<1x32xf32>
    %229 = arith.addi %3, %216 : i32
    %c2_i32_74 = arith.constant 2 : i32
    %230 = arith.addi %229, %c2_i32_74 : i32
    %231 = arith.index_cast %230 : i32 to index
    %232 = memref.load %arg1[%231] : memref<64xi32, #tpu.memory_space<smem>>
    %233 = arith.index_cast %232 : i32 to index
    %c0_75 = arith.constant 0 : index
    %234 = vector.load %arg4[%233, %c0_75] : memref<512x32xf32, #tpu.memory_space<vmem>>, vector<1x32xf32>
    %235 = arith.addi %3, %216 : i32
    %c3_i32_76 = arith.constant 3 : i32
    %236 = arith.addi %235, %c3_i32_76 : i32
    %237 = arith.index_cast %236 : i32 to index
    %238 = memref.load %arg1[%237] : memref<64xi32, #tpu.memory_space<smem>>
    %239 = arith.index_cast %238 : i32 to index
    %c0_77 = arith.constant 0 : index
    %240 = vector.load %arg4[%239, %c0_77] : memref<512x32xf32, #tpu.memory_space<vmem>>, vector<1x32xf32>
    %241 = arith.addi %3, %216 : i32
    %c4_i32_78 = arith.constant 4 : i32
    %242 = arith.addi %241, %c4_i32_78 : i32
    %243 = arith.index_cast %242 : i32 to index
    %244 = memref.load %arg1[%243] : memref<64xi32, #tpu.memory_space<smem>>
    %245 = arith.index_cast %244 : i32 to index
    %c0_79 = arith.constant 0 : index
    %246 = vector.load %arg4[%245, %c0_79] : memref<512x32xf32, #tpu.memory_space<vmem>>, vector<1x32xf32>
    %247 = arith.addi %3, %216 : i32
    %c5_i32_80 = arith.constant 5 : i32
    %248 = arith.addi %247, %c5_i32_80 : i32
    %249 = arith.index_cast %248 : i32 to index
    %250 = memref.load %arg1[%249] : memref<64xi32, #tpu.memory_space<smem>>
    %251 = arith.index_cast %250 : i32 to index
    %c0_81 = arith.constant 0 : index
    %252 = vector.load %arg4[%251, %c0_81] : memref<512x32xf32, #tpu.memory_space<vmem>>, vector<1x32xf32>
    %253 = arith.addi %3, %216 : i32
    %c6_i32_82 = arith.constant 6 : i32
    %254 = arith.addi %253, %c6_i32_82 : i32
    %255 = arith.index_cast %254 : i32 to index
    %256 = memref.load %arg1[%255] : memref<64xi32, #tpu.memory_space<smem>>
    %257 = arith.index_cast %256 : i32 to index
    %c0_83 = arith.constant 0 : index
    %258 = vector.load %arg4[%257, %c0_83] : memref<512x32xf32, #tpu.memory_space<vmem>>, vector<1x32xf32>
    %259 = arith.addi %3, %216 : i32
    %c7_i32_84 = arith.constant 7 : i32
    %260 = arith.addi %259, %c7_i32_84 : i32
    %261 = arith.index_cast %260 : i32 to index
    %262 = memref.load %arg1[%261] : memref<64xi32, #tpu.memory_space<smem>>
    %263 = arith.index_cast %262 : i32 to index
    %c0_85 = arith.constant 0 : index
    %264 = vector.load %arg4[%263, %c0_85] : memref<512x32xf32, #tpu.memory_space<vmem>>, vector<1x32xf32>
    %265 = tpu.concatenate %222, %228, %234, %240, %246, %252, %258, %264 in 0 : vector<1x32xf32>, vector<1x32xf32>, vector<1x32xf32>, vector<1x32xf32>, vector<1x32xf32>, vector<1x32xf32>, vector<1x32xf32>, vector<1x32xf32> -> vector<8x32xf32>
    %266 = tpu.assume_multiple %216, 8 : i32
    %267 = arith.index_cast %266 : i32 to index
    %c0_86 = arith.constant 0 : index
    %268 = vector.load %arg3[%267, %c0_86] : memref<64x32xf32, #tpu.memory_space<vmem>>, vector<8x32xf32>
    tpu.vector_store %arg3[%267, %c0_86], %265 {strides = array<i32>} : memref<64x32xf32, #tpu.memory_space<vmem>>, vector<8x32xf32>,
    %c5_i32_87 = arith.constant 5 : i32
    %c8_i32_88 = arith.constant 8 : i32
    %269 = arith.muli %c5_i32_87, %c8_i32_88 : i32
    %270 = arith.addi %3, %269 : i32
    %c0_i32_89 = arith.constant 0 : i32
    %271 = arith.addi %270, %c0_i32_89 : i32
    %272 = arith.index_cast %271 : i32 to index
    %273 = memref.load %arg1[%272] : memref<64xi32, #tpu.memory_space<smem>>
    %274 = arith.index_cast %273 : i32 to index
    %c0_90 = arith.constant 0 : index
    %275 = vector.load %arg4[%274, %c0_90] : memref<512x32xf32, #tpu.memory_space<vmem>>, vector<1x32xf32>
    %276 = arith.addi %3, %269 : i32
    %c1_i32_91 = arith.constant 1 : i32
    %277 = arith.addi %276, %c1_i32_91 : i32
    %278 = arith.index_cast %277 : i32 to index
    %279 = memref.load %arg1[%278] : memref<64xi32, #tpu.memory_space<smem>>
    %280 = arith.index_cast %279 : i32 to index
    %c0_92 = arith.constant 0 : index
    %281 = vector.load %arg4[%280, %c0_92] : memref<512x32xf32, #tpu.memory_space<vmem>>, vector<1x32xf32>
    %282 = arith.addi %3, %269 : i32
    %c2_i32_93 = arith.constant 2 : i32
    %283 = arith.addi %282, %c2_i32_93 : i32
    %284 = arith.index_cast %283 : i32 to index
    %285 = memref.load %arg1[%284] : memref<64xi32, #tpu.memory_space<smem>>
    %286 = arith.index_cast %285 : i32 to index
    %c0_94 = arith.constant 0 : index
    %287 = vector.load %arg4[%286, %c0_94] : memref<512x32xf32, #tpu.memory_space<vmem>>, vector<1x32xf32>
    %288 = arith.addi %3, %269 : i32
    %c3_i32_95 = arith.constant 3 : i32
    %289 = arith.addi %288, %c3_i32_95 : i32
    %290 = arith.index_cast %289 : i32 to index
    %291 = memref.load %arg1[%290] : memref<64xi32, #tpu.memory_space<smem>>
    %292 = arith.index_cast %291 : i32 to index
    %c0_96 = arith.constant 0 : index
    %293 = vector.load %arg4[%292, %c0_96] : memref<512x32xf32, #tpu.memory_space<vmem>>, vector<1x32xf32>
    %294 = arith.addi %3, %269 : i32
    %c4_i32_97 = arith.constant 4 : i32
    %295 = arith.addi %294, %c4_i32_97 : i32
    %296 = arith.index_cast %295 : i32 to index
    %297 = memref.load %arg1[%296] : memref<64xi32, #tpu.memory_space<smem>>
    %298 = arith.index_cast %297 : i32 to index
    %c0_98 = arith.constant 0 : index
    %299 = vector.load %arg4[%298, %c0_98] : memref<512x32xf32, #tpu.memory_space<vmem>>, vector<1x32xf32>
    %300 = arith.addi %3, %269 : i32
    %c5_i32_99 = arith.constant 5 : i32
    %301 = arith.addi %300, %c5_i32_99 : i32
    %302 = arith.index_cast %301 : i32 to index
    %303 = memref.load %arg1[%302] : memref<64xi32, #tpu.memory_space<smem>>
    %304 = arith.index_cast %303 : i32 to index
    %c0_100 = arith.constant 0 : index
    %305 = vector.load %arg4[%304, %c0_100] : memref<512x32xf32, #tpu.memory_space<vmem>>, vector<1x32xf32>
    %306 = arith.addi %3, %269 : i32
    %c6_i32_101 = arith.constant 6 : i32
    %307 = arith.addi %306, %c6_i32_101 : i32
    %308 = arith.index_cast %307 : i32 to index
    %309 = memref.load %arg1[%308] : memref<64xi32, #tpu.memory_space<smem>>
    %310 = arith.index_cast %309 : i32 to index
    %c0_102 = arith.constant 0 : index
    %311 = vector.load %arg4[%310, %c0_102] : memref<512x32xf32, #tpu.memory_space<vmem>>, vector<1x32xf32>
    %312 = arith.addi %3, %269 : i32
    %c7_i32_103 = arith.constant 7 : i32
    %313 = arith.addi %312, %c7_i32_103 : i32
    %314 = arith.index_cast %313 : i32 to index
    %315 = memref.load %arg1[%314] : memref<64xi32, #tpu.memory_space<smem>>
    %316 = arith.index_cast %315 : i32 to index
    %c0_104 = arith.constant 0 : index
    %317 = vector.load %arg4[%316, %c0_104] : memref<512x32xf32, #tpu.memory_space<vmem>>, vector<1x32xf32>
    %318 = tpu.concatenate %275, %281, %287, %293, %299, %305, %311, %317 in 0 : vector<1x32xf32>, vector<1x32xf32>, vector<1x32xf32>, vector<1x32xf32>, vector<1x32xf32>, vector<1x32xf32>, vector<1x32xf32>, vector<1x32xf32> -> vector<8x32xf32>
    %319 = tpu.assume_multiple %269, 8 : i32
    %320 = arith.index_cast %319 : i32 to index
    %c0_105 = arith.constant 0 : index
    %321 = vector.load %arg3[%320, %c0_105] : memref<64x32xf32, #tpu.memory_space<vmem>>, vector<8x32xf32>
    tpu.vector_store %arg3[%320, %c0_105], %318 {strides = array<i32>} : memref<64x32xf32, #tpu.memory_space<vmem>>, vector<8x32xf32>,
    %c6_i32_106 = arith.constant 6 : i32
    %c8_i32_107 = arith.constant 8 : i32
    %322 = arith.muli %c6_i32_106, %c8_i32_107 : i32
    %323 = arith.addi %3, %322 : i32
    %c0_i32_108 = arith.constant 0 : i32
    %324 = arith.addi %323, %c0_i32_108 : i32
    %325 = arith.index_cast %324 : i32 to index
    %326 = memref.load %arg1[%325] : memref<64xi32, #tpu.memory_space<smem>>
    %327 = arith.index_cast %326 : i32 to index
    %c0_109 = arith.constant 0 : index
    %328 = vector.load %arg4[%327, %c0_109] : memref<512x32xf32, #tpu.memory_space<vmem>>, vector<1x32xf32>
    %329 = arith.addi %3, %322 : i32
    %c1_i32_110 = arith.constant 1 : i32
    %330 = arith.addi %329, %c1_i32_110 : i32
    %331 = arith.index_cast %330 : i32 to index
    %332 = memref.load %arg1[%331] : memref<64xi32, #tpu.memory_space<smem>>
    %333 = arith.index_cast %332 : i32 to index
    %c0_111 = arith.constant 0 : index
    %334 = vector.load %arg4[%333, %c0_111] : memref<512x32xf32, #tpu.memory_space<vmem>>, vector<1x32xf32>
    %335 = arith.addi %3, %322 : i32
    %c2_i32_112 = arith.constant 2 : i32
    %336 = arith.addi %335, %c2_i32_112 : i32
    %337 = arith.index_cast %336 : i32 to index
    %338 = memref.load %arg1[%337] : memref<64xi32, #tpu.memory_space<smem>>
    %339 = arith.index_cast %338 : i32 to index
    %c0_113 = arith.constant 0 : index
    %340 = vector.load %arg4[%339, %c0_113] : memref<512x32xf32, #tpu.memory_space<vmem>>, vector<1x32xf32>
    %341 = arith.addi %3, %322 : i32
    %c3_i32_114 = arith.constant 3 : i32
    %342 = arith.addi %341, %c3_i32_114 : i32
    %343 = arith.index_cast %342 : i32 to index
    %344 = memref.load %arg1[%343] : memref<64xi32, #tpu.memory_space<smem>>
    %345 = arith.index_cast %344 : i32 to index
    %c0_115 = arith.constant 0 : index
    %346 = vector.load %arg4[%345, %c0_115] : memref<512x32xf32, #tpu.memory_space<vmem>>, vector<1x32xf32>
    %347 = arith.addi %3, %322 : i32
    %c4_i32_116 = arith.constant 4 : i32
    %348 = arith.addi %347, %c4_i32_116 : i32
    %349 = arith.index_cast %348 : i32 to index
    %350 = memref.load %arg1[%349] : memref<64xi32, #tpu.memory_space<smem>>
    %351 = arith.index_cast %350 : i32 to index
    %c0_117 = arith.constant 0 : index
    %352 = vector.load %arg4[%351, %c0_117] : memref<512x32xf32, #tpu.memory_space<vmem>>, vector<1x32xf32>
    %353 = arith.addi %3, %322 : i32
    %c5_i32_118 = arith.constant 5 : i32
    %354 = arith.addi %353, %c5_i32_118 : i32
    %355 = arith.index_cast %354 : i32 to index
    %356 = memref.load %arg1[%355] : memref<64xi32, #tpu.memory_space<smem>>
    %357 = arith.index_cast %356 : i32 to index
    %c0_119 = arith.constant 0 : index
    %358 = vector.load %arg4[%357, %c0_119] : memref<512x32xf32, #tpu.memory_space<vmem>>, vector<1x32xf32>
    %359 = arith.addi %3, %322 : i32
    %c6_i32_120 = arith.constant 6 : i32
    %360 = arith.addi %359, %c6_i32_120 : i32
    %361 = arith.index_cast %360 : i32 to index
    %362 = memref.load %arg1[%361] : memref<64xi32, #tpu.memory_space<smem>>
    %363 = arith.index_cast %362 : i32 to index
    %c0_121 = arith.constant 0 : index
    %364 = vector.load %arg4[%363, %c0_121] : memref<512x32xf32, #tpu.memory_space<vmem>>, vector<1x32xf32>
    %365 = arith.addi %3, %322 : i32
    %c7_i32_122 = arith.constant 7 : i32
    %366 = arith.addi %365, %c7_i32_122 : i32
    %367 = arith.index_cast %366 : i32 to index
    %368 = memref.load %arg1[%367] : memref<64xi32, #tpu.memory_space<smem>>
    %369 = arith.index_cast %368 : i32 to index
    %c0_123 = arith.constant 0 : index
    %370 = vector.load %arg4[%369, %c0_123] : memref<512x32xf32, #tpu.memory_space<vmem>>, vector<1x32xf32>
    %371 = tpu.concatenate %328, %334, %340, %346, %352, %358, %364, %370 in 0 : vector<1x32xf32>, vector<1x32xf32>, vector<1x32xf32>, vector<1x32xf32>, vector<1x32xf32>, vector<1x32xf32>, vector<1x32xf32>, vector<1x32xf32> -> vector<8x32xf32>
    %372 = tpu.assume_multiple %322, 8 : i32
    %373 = arith.index_cast %372 : i32 to index
    %c0_124 = arith.constant 0 : index
    %374 = vector.load %arg3[%373, %c0_124] : memref<64x32xf32, #tpu.memory_space<vmem>>, vector<8x32xf32>
    tpu.vector_store %arg3[%373, %c0_124], %371 {strides = array<i32>} : memref<64x32xf32, #tpu.memory_space<vmem>>, vector<8x32xf32>,
    %c7_i32_125 = arith.constant 7 : i32
    %c8_i32_126 = arith.constant 8 : i32
    %375 = arith.muli %c7_i32_125, %c8_i32_126 : i32
    %376 = arith.addi %3, %375 : i32
    %c0_i32_127 = arith.constant 0 : i32
    %377 = arith.addi %376, %c0_i32_127 : i32
    %378 = arith.index_cast %377 : i32 to index
    %379 = memref.load %arg1[%378] : memref<64xi32, #tpu.memory_space<smem>>
    %380 = arith.index_cast %379 : i32 to index
    %c0_128 = arith.constant 0 : index
    %381 = vector.load %arg4[%380, %c0_128] : memref<512x32xf32, #tpu.memory_space<vmem>>, vector<1x32xf32>
    %382 = arith.addi %3, %375 : i32
    %c1_i32_129 = arith.constant 1 : i32
    %383 = arith.addi %382, %c1_i32_129 : i32
    %384 = arith.index_cast %383 : i32 to index
    %385 = memref.load %arg1[%384] : memref<64xi32, #tpu.memory_space<smem>>
    %386 = arith.index_cast %385 : i32 to index
    %c0_130 = arith.constant 0 : index
    %387 = vector.load %arg4[%386, %c0_130] : memref<512x32xf32, #tpu.memory_space<vmem>>, vector<1x32xf32>
    %388 = arith.addi %3, %375 : i32
    %c2_i32_131 = arith.constant 2 : i32
    %389 = arith.addi %388, %c2_i32_131 : i32
    %390 = arith.index_cast %389 : i32 to index
    %391 = memref.load %arg1[%390] : memref<64xi32, #tpu.memory_space<smem>>
    %392 = arith.index_cast %391 : i32 to index
    %c0_132 = arith.constant 0 : index
    %393 = vector.load %arg4[%392, %c0_132] : memref<512x32xf32, #tpu.memory_space<vmem>>, vector<1x32xf32>
    %394 = arith.addi %3, %375 : i32
    %c3_i32_133 = arith.constant 3 : i32
    %395 = arith.addi %394, %c3_i32_133 : i32
    %396 = arith.index_cast %395 : i32 to index
    %397 = memref.load %arg1[%396] : memref<64xi32, #tpu.memory_space<smem>>
    %398 = arith.index_cast %397 : i32 to index
    %c0_134 = arith.constant 0 : index
    %399 = vector.load %arg4[%398, %c0_134] : memref<512x32xf32, #tpu.memory_space<vmem>>, vector<1x32xf32>
    %400 = arith.addi %3, %375 : i32
    %c4_i32_135 = arith.constant 4 : i32
    %401 = arith.addi %400, %c4_i32_135 : i32
    %402 = arith.index_cast %401 : i32 to index
    %403 = memref.load %arg1[%402] : memref<64xi32, #tpu.memory_space<smem>>
    %404 = arith.index_cast %403 : i32 to index
    %c0_136 = arith.constant 0 : index
    %405 = vector.load %arg4[%404, %c0_136] : memref<512x32xf32, #tpu.memory_space<vmem>>, vector<1x32xf32>
    %406 = arith.addi %3, %375 : i32
    %c5_i32_137 = arith.constant 5 : i32
    %407 = arith.addi %406, %c5_i32_137 : i32
    %408 = arith.index_cast %407 : i32 to index
    %409 = memref.load %arg1[%408] : memref<64xi32, #tpu.memory_space<smem>>
    %410 = arith.index_cast %409 : i32 to index
    %c0_138 = arith.constant 0 : index
    %411 = vector.load %arg4[%410, %c0_138] : memref<512x32xf32, #tpu.memory_space<vmem>>, vector<1x32xf32>
    %412 = arith.addi %3, %375 : i32
    %c6_i32_139 = arith.constant 6 : i32
    %413 = arith.addi %412, %c6_i32_139 : i32
    %414 = arith.index_cast %413 : i32 to index
    %415 = memref.load %arg1[%414] : memref<64xi32, #tpu.memory_space<smem>>
    %416 = arith.index_cast %415 : i32 to index
    %c0_140 = arith.constant 0 : index
    %417 = vector.load %arg4[%416, %c0_140] : memref<512x32xf32, #tpu.memory_space<vmem>>, vector<1x32xf32>
    %418 = arith.addi %3, %375 : i32
    %c7_i32_141 = arith.constant 7 : i32
    %419 = arith.addi %418, %c7_i32_141 : i32
    %420 = arith.index_cast %419 : i32 to index
    %421 = memref.load %arg1[%420] : memref<64xi32, #tpu.memory_space<smem>>
    %422 = arith.index_cast %421 : i32 to index
    %c0_142 = arith.constant 0 : index
    %423 = vector.load %arg4[%422, %c0_142] : memref<512x32xf32, #tpu.memory_space<vmem>>, vector<1x32xf32>
    %424 = tpu.concatenate %381, %387, %393, %399, %405, %411, %417, %423 in 0 : vector<1x32xf32>, vector<1x32xf32>, vector<1x32xf32>, vector<1x32xf32>, vector<1x32xf32>, vector<1x32xf32>, vector<1x32xf32>, vector<1x32xf32> -> vector<8x32xf32>
    %425 = tpu.assume_multiple %375, 8 : i32
    %426 = arith.index_cast %425 : i32 to index
    %c0_143 = arith.constant 0 : index
    %427 = vector.load %arg3[%426, %c0_143] : memref<64x32xf32, #tpu.memory_space<vmem>>, vector<8x32xf32>
    tpu.vector_store %arg3[%426, %c0_143], %424 {strides = array<i32>} : memref<64x32xf32, #tpu.memory_space<vmem>>, vector<8x32xf32>,
    %c8_i32_144 = arith.constant 8 : i32
    return
  }
  func.func @transform_1(%arg0: i32, %arg1: memref<64xi32, #tpu.memory_space<smem>>) -> (i32, i32) {
    %c0_i32 = arith.constant 0 : i32
    %c0_i32_0 = arith.constant 0 : i32
    return %arg0, %c0_i32 : i32, i32
  }
}

</mosaic_0001>

<bundles_post_ra>
// kernel: tpu_custom_call.1
= control target key start
LH: loop header
LB: loop body
LE: loop exit
PB: predicated region body
PF: predicated region fallthrough
CT: control target
= control target key end

     0   :  { %s835_s12 = smov [#allocation5]   ;;  %s1263_s0 = inlined_call_operand.vmem [shape: s32[64], index: 0, kind: input, shape index: {}]   ;;  %s1264_s1 = inlined_call_operand.vmem [shape: f32[512,32], index: 1, kind: input, shape index: {}]   ;;  %s1265_s2 = inlined_call_operand.vmem [shape: f32[64,32], index: 2, kind: output, shape index: {}]  }
   0x1   :  { %s8_s11 = sshll.u32 %s1263_s0, 4  ;;  %s9_s11 = int_to_ptr.vmem [resolvable:$true] %s8_s11 }
   0x2   :  { %11 = dma.vmem_to_smem %s9_s11, 16, %s835_s12, [#allocation4] }
   0x3   :  { %831 = dma.done.wait [#allocation4], 16 }
   0x4   :  { %832 = vsyncadd [#allocation4], 4294967280 }
   0x5   :  { %14 = sfence }
   0x6   :  { %v29_v0 = vld [vmem:[%s1264_s1] sm:$0xff]  ;;  %v31_v1 = vld [vmem:[%s1264_s1 + $0x8] sm:$0xff]  ;;  %v33_v2 = vld [vmem:[%s1264_s1 + $0x10] sm:$0xff] }
   0x7   :  { %30 = vst [vmem:[#allocation2] sm:$0xff] %v29_v0  ;;  %v35_v3 = vld [vmem:[%s1264_s1 + $0x18] sm:$0xff]  ;;  %v37_v4 = vld [vmem:[%s1264_s1 + $0x20] sm:$0xff]  ;;  %v39_v5 = vld [vmem:[%s1264_s1 + $0x28] sm:$0xff] }
   0x8   :  { %32 = vst [vmem:[#allocation2 + $0x8] sm:$0xff] %v31_v1  ;;  %v41_v6 = vld [vmem:[%s1264_s1 + $0x30] sm:$0xff]  ;;  %v43_v7 = vld [vmem:[%s1264_s1 + $0x38] sm:$0xff]  ;;  %v45_v8 = vld [vmem:[%s1264_s1 + $0x40] sm:$0xff] }
   0x9   :  { %34 = vst [vmem:[#allocation2 + $0x10] sm:$0xff] %v33_v2  ;;  %v47_v9 = vld [vmem:[%s1264_s1 + $0x48] sm:$0xff]  ;;  %v49_v10 = vld [vmem:[%s1264_s1 + $0x50] sm:$0xff]  ;;  %v51_v11 = vld [vmem:[%s1264_s1 + $0x58] sm:$0xff] }
   0xa   :  { %36 = vst [vmem:[#allocation2 + $0x18] sm:$0xff] %v35_v3  ;;  %v53_v12 = vld [vmem:[%s1264_s1 + $0x60] sm:$0xff]  ;;  %v55_v13 = vld [vmem:[%s1264_s1 + $0x68] sm:$0xff]  ;;  %v57_v14 = vld [vmem:[%s1264_s1 + $0x70] sm:$0xff] }
   0xb   :  { %38 = vst [vmem:[#allocation2 + $0x20] sm:$0xff] %v37_v4  ;;  %v59_v15 = vld [vmem:[%s1264_s1 + $0x78] sm:$0xff]  ;;  %v61_v16 = vld [vmem:[%s1264_s1 + $0x80] sm:$0xff]  ;;  %v63_v17 = vld [vmem:[%s1264_s1 + $0x88] sm:$0xff] }
   0xc   :  { %40 = vst [vmem:[#allocation2 + $0x28] sm:$0xff] %v39_v5  ;;  %v65_v18 = vld [vmem:[%s1264_s1 + $0x90] sm:$0xff]  ;;  %v67_v19 = vld [vmem:[%s1264_s1 + $0x98] sm:$0xff]  ;;  %v69_v20 = vld [vmem:[%s1264_s1 + $0xa0] sm:$0xff] }
   0xd   :  { %42 = vst [vmem:[#allocation2 + $0x30] sm:$0xff] %v41_v6  ;;  %v71_v21 = vld [vmem:[%s1264_s1 + $0xa8] sm:$0xff]  ;;  %v73_v22 = vld [vmem:[%s1264_s1 + $0xb0] sm:$0xff]  ;;  %v75_v23 = vld [vmem:[%s1264_s1 + $0xb8] sm:$0xff] }
   0xe   :  { %44 = vst [vmem:[#allocation2 + $0x38] sm:$0xff] %v43_v7  ;;  %v77_v24 = vld [vmem:[%s1264_s1 + $0xc0] sm:$0xff]  ;;  %v79_v25 = vld [vmem:[%s1264_s1 + $0xc8] sm:$0xff]  ;;  %v81_v26 = vld [vmem:[%s1264_s1 + $0xd0] sm:$0xff] }
   0xf   :  { %46 = vst [vmem:[#allocation2 + $0x40] sm:$0xff] %v45_v8  ;;  %v83_v27 = vld [vmem:[%s1264_s1 + $0xd8] sm:$0xff]  ;;  %v85_v28 = vld [vmem:[%s1264_s1 + $0xe0] sm:$0xff]  ;;  %v87_v29 = vld [vmem:[%s1264_s1 + $0xe8] sm:$0xff] }
  0x10   :  { %48 = vst [vmem:[#allocation2 + $0x48] sm:$0xff] %v47_v9  ;;  %v89_v30 = vld [vmem:[%s1264_s1 + $0xf0] sm:$0xff]  ;;  %v91_v31 = vld [vmem:[%s1264_s1 + $0xf8] sm:$0xff]  ;;  %v93_v32 = vld [vmem:[%s1264_s1 + $0x100] sm:$0xff] }
  0x11   :  { %50 = vst [vmem:[#allocation2 + $0x50] sm:$0xff] %v49_v10  ;;  %v95_v33 = vld [vmem:[%s1264_s1 + $0x108] sm:$0xff]  ;;  %v97_v34 = vld [vmem:[%s1264_s1 + $0x110] sm:$0xff]  ;;  %v99_v35 = vld [vmem:[%s1264_s1 + $0x118] sm:$0xff] }
  0x12   :  { %52 = vst [vmem:[#allocation2 + $0x58] sm:$0xff] %v51_v11  ;;  %v101_v36 = vld [vmem:[%s1264_s1 + $0x120] sm:$0xff]  ;;  %v103_v37 = vld [vmem:[%s1264_s1 + $0x128] sm:$0xff]  ;;  %v105_v38 = vld [vmem:[%s1264_s1 + $0x130] sm:$0xff] }
  0x13   :  { %54 = vst [vmem:[#allocation2 + $0x60] sm:$0xff] %v53_v12  ;;  %v107_v39 = vld [vmem:[%s1264_s1 + $0x138] sm:$0xff]  ;;  %v109_v40 = vld [vmem:[%s1264_s1 + $0x140] sm:$0xff]  ;;  %v111_v41 = vld [vmem:[%s1264_s1 + $0x148] sm:$0xff] }
  0x14   :  { %56 = vst [vmem:[#allocation2 + $0x68] sm:$0xff] %v55_v13  ;;  %v113_v42 = vld [vmem:[%s1264_s1 + $0x150] sm:$0xff]  ;;  %v115_v43 = vld [vmem:[%s1264_s1 + $0x158] sm:$0xff]  ;;  %v117_v44 = vld [vmem:[%s1264_s1 + $0x160] sm:$0xff] }
  0x15   :  { %58 = vst [vmem:[#allocation2 + $0x70] sm:$0xff] %v57_v14  ;;  %v119_v45 = vld [vmem:[%s1264_s1 + $0x168] sm:$0xff]  ;;  %v121_v46 = vld [vmem:[%s1264_s1 + $0x170] sm:$0xff]  ;;  %v123_v47 = vld [vmem:[%s1264_s1 + $0x178] sm:$0xff] }
  0x16   :  { %60 = vst [vmem:[#allocation2 + $0x78] sm:$0xff] %v59_v15  ;;  %v125_v48 = vld [vmem:[%s1264_s1 + $0x180] sm:$0xff]  ;;  %v127_v49 = vld [vmem:[%s1264_s1 + $0x188] sm:$0xff]  ;;  %v129_v50 = vld [vmem:[%s1264_s1 + $0x190] sm:$0xff] }
  0x17   :  { %62 = vst [vmem:[#allocation2 + $0x80] sm:$0xff] %v61_v16  ;;  %v131_v51 = vld [vmem:[%s1264_s1 + $0x198] sm:$0xff]  ;;  %v133_v52 = vld [vmem:[%s1264_s1 + $0x1a0] sm:$0xff]  ;;  %v135_v53 = vld [vmem:[%s1264_s1 + $0x1a8] sm:$0xff] }
  0x18   :  { %64 = vst [vmem:[#allocation2 + $0x88] sm:$0xff] %v63_v17  ;;  %v137_v54 = vld [vmem:[%s1264_s1 + $0x1b0] sm:$0xff]  ;;  %v139_v55 = vld [vmem:[%s1264_s1 + $0x1b8] sm:$0xff]  ;;  %v141_v56 = vld [vmem:[%s1264_s1 + $0x1c0] sm:$0xff] }
  0x19   :  { %66 = vst [vmem:[#allocation2 + $0x90] sm:$0xff] %v65_v18  ;;  %v143_v57 = vld [vmem:[%s1264_s1 + $0x1c8] sm:$0xff]  ;;  %v145_v58 = vld [vmem:[%s1264_s1 + $0x1d0] sm:$0xff]  ;;  %v147_v59 = vld [vmem:[%s1264_s1 + $0x1d8] sm:$0xff] }
  0x1a   :  { %68 = vst [vmem:[#allocation2 + $0x98] sm:$0xff] %v67_v19  ;;  %v149_v60 = vld [vmem:[%s1264_s1 + $0x1e0] sm:$0xff]  ;;  %v151_v61 = vld [vmem:[%s1264_s1 + $0x1e8] sm:$0xff]  ;;  %v153_v62 = vld [vmem:[%s1264_s1 + $0x1f0] sm:$0xff] }
  0x1b   :  { %70 = vst [vmem:[#allocation2 + $0xa0] sm:$0xff] %v69_v20  ;;  %v155_v63 = vld [vmem:[%s1264_s1 + $0x1f8] sm:$0xff] }
  0x1c   :  { %72 = vst [vmem:[#allocation2 + $0xa8] sm:$0xff] %v71_v21 }
  0x1d   :  { %74 = vst [vmem:[#allocation2 + $0xb0] sm:$0xff] %v73_v22 }
  0x1e   :  { %76 = vst [vmem:[#allocation2 + $0xb8] sm:$0xff] %v75_v23 }
  0x1f   :  { %78 = vst [vmem:[#allocation2 + $0xc0] sm:$0xff] %v77_v24 }
  0x20   :  { %80 = vst [vmem:[#allocation2 + $0xc8] sm:$0xff] %v79_v25 }
  0x21   :  { %82 = vst [vmem:[#allocation2 + $0xd0] sm:$0xff] %v81_v26 }
  0x22   :  { %84 = vst [vmem:[#allocation2 + $0xd8] sm:$0xff] %v83_v27 }
  0x23   :  { %86 = vst [vmem:[#allocation2 + $0xe0] sm:$0xff] %v85_v28 }
  0x24   :  { %88 = vst [vmem:[#allocation2 + $0xe8] sm:$0xff] %v87_v29 }
  0x25   :  { %90 = vst [vmem:[#allocation2 + $0xf0] sm:$0xff] %v89_v30 }
  0x26   :  { %92 = vst [vmem:[#allocation2 + $0xf8] sm:$0xff] %v91_v31 }
  0x27   :  { %94 = vst [vmem:[#allocation2 + $0x100] sm:$0xff] %v93_v32 }
  0x28   :  { %96 = vst [vmem:[#allocation2 + $0x108] sm:$0xff] %v95_v33 }
  0x29   :  { %98 = vst [vmem:[#allocation2 + $0x110] sm:$0xff] %v97_v34 }
  0x2a   :  { %100 = vst [vmem:[#allocation2 + $0x118] sm:$0xff] %v99_v35 }
  0x2b   :  { %102 = vst [vmem:[#allocation2 + $0x120] sm:$0xff] %v101_v36 }
  0x2c   :  { %104 = vst [vmem:[#allocation2 + $0x128] sm:$0xff] %v103_v37 }
  0x2d   :  { %106 = vst [vmem:[#allocation2 + $0x130] sm:$0xff] %v105_v38 }
  0x2e   :  { %108 = vst [vmem:[#allocation2 + $0x138] sm:$0xff] %v107_v39 }
  0x2f   :  { %110 = vst [vmem:[#allocation2 + $0x140] sm:$0xff] %v109_v40 }
  0x30   :  { %112 = vst [vmem:[#allocation2 + $0x148] sm:$0xff] %v111_v41 }
  0x31   :  { %114 = vst [vmem:[#allocation2 + $0x150] sm:$0xff] %v113_v42 }
  0x32   :  { %116 = vst [vmem:[#allocation2 + $0x158] sm:$0xff] %v115_v43 }
  0x33   :  { %118 = vst [vmem:[#allocation2 + $0x160] sm:$0xff] %v117_v44 }
  0x34   :  { %120 = vst [vmem:[#allocation2 + $0x168] sm:$0xff] %v119_v45 }
  0x35   :  { %122 = vst [vmem:[#allocation2 + $0x170] sm:$0xff] %v121_v46 }
  0x36   :  { %124 = vst [vmem:[#allocation2 + $0x178] sm:$0xff] %v123_v47 }
  0x37   :  { %126 = vst [vmem:[#allocation2 + $0x180] sm:$0xff] %v125_v48 }
  0x38   :  { %128 = vst [vmem:[#allocation2 + $0x188] sm:$0xff] %v127_v49 }
  0x39   :  { %130 = vst [vmem:[#allocation2 + $0x190] sm:$0xff] %v129_v50 }
  0x3a   :  { %132 = vst [vmem:[#allocation2 + $0x198] sm:$0xff] %v131_v51 }
  0x3b   :  { %134 = vst [vmem:[#allocation2 + $0x1a0] sm:$0xff] %v133_v52 }
  0x3c   :  { %136 = vst [vmem:[#allocation2 + $0x1a8] sm:$0xff] %v135_v53 }
  0x3d   :  { %138 = vst [vmem:[#allocation2 + $0x1b0] sm:$0xff] %v137_v54 }
  0x3e   :  { %140 = vst [vmem:[#allocation2 + $0x1b8] sm:$0xff] %v139_v55 }
  0x3f   :  { %142 = vst [vmem:[#allocation2 + $0x1c0] sm:$0xff] %v141_v56 }
  0x40   :  { %144 = vst [vmem:[#allocation2 + $0x1c8] sm:$0xff] %v143_v57 }
  0x41   :  { %146 = vst [vmem:[#allocation2 + $0x1d0] sm:$0xff] %v145_v58 }
  0x42   :  { %148 = vst [vmem:[#allocation2 + $0x1d8] sm:$0xff] %v147_v59 }
  0x43   :  { %150 = vst [vmem:[#allocation2 + $0x1e0] sm:$0xff] %v149_v60 }
  0x44   :  { %152 = vst [vmem:[#allocation2 + $0x1e8] sm:$0xff] %v151_v61 }
  0x45   :  { %154 = vst [vmem:[#allocation2 + $0x1f0] sm:$0xff] %v153_v62 }
  0x46   :  { %156 = vst [vmem:[#allocation2 + $0x1f8] sm:$0xff] %v155_v63 }
  0x47   :  { %162 = vsyncadd [#allocation3], 8192 }
  0x48   :  { %833 = dma.done.wait [#allocation3], 8192 }
  0x49   :  { %834 = vsyncadd [#allocation3], 4294959104  ;;  %s167_s24 = sld [smem:[#allocation5]]  ;;  %vm219_vm0 = vcmask 1040384   ;;  %vm221_vm1 = vcmask 1041408   ;;  %vm223_vm2 = vcmask 1042432  }
  0x4a   :  { %s747_s25 = sld [smem:[#allocation5 + $0x1]]  ;;  %vm225_vm3 = vcmask 1043456   ;;  %vm227_vm4 = vcmask 1044480   ;;  %vm229_vm5 = vcmask 1045504   ;;  %vm231_vm6 = vcmask 1046528  }
  0x4b   :  { %s748_s26 = sld [smem:[#allocation5 + $0x2]]  ;;  %vm233_vm7 = vcmask 261120  }
  0x4c   :  { %s749_s27 = sld [smem:[#allocation5 + $0x3]] }
  0x4d   :  { %s750_s28 = sld [smem:[#allocation5 + $0x4]] }
  0x4e   :  { %s1046_s29 = sld [smem:[#allocation5 + $0x5]] }
  0x4f   :  { %s1048_s30 = sld [smem:[#allocation5 + $0x6]]  ;;  %s168_s1 = scalar_lea.vmem [#allocation2], %s167_s24 }
  0x50   :  { %v169_v0 = vld [vmem:[%s168_s1] sm:$0x1]  ;;  %s1050_s3 = sld [smem:[#allocation5 + $0x7]]  ;;  %s172_s4 = scalar_lea.vmem [#allocation2], %s747_s25 }
  0x51   :  { %v173_v1 = vld [vmem:[%s172_s4] sm:$0x1]  ;;  %s1052_s5 = sld [smem:[#allocation5 + $0x8]]  ;;  %s176_s6 = scalar_lea.vmem [#allocation2], %s748_s26 }
  0x52   :  { %v177_v2 = vld [vmem:[%s176_s6] sm:$0x1]  ;;  %v199_v3 = vrot.slane %v173_v1, 7  ;;  %s1054_s7 = sld [smem:[#allocation5 + $0x9]]  ;;  %s180_s8 = scalar_lea.vmem [#allocation2], %s749_s27 }
  0x53   :  { %v181_v4 = vld [vmem:[%s180_s8] sm:$0x1]  ;;  %v202_v5 = vrot.slane %v177_v2, 6  ;;  %s1056_s9 = sld [smem:[#allocation5 + $0xa]]  ;;  %s184_s10 = scalar_lea.vmem [#allocation2], %s750_s28 }
  0x54   :  { %v185_v6 = vld [vmem:[%s184_s10] sm:$0x1]  ;;  %v205_v7 = vrot.slane %v181_v4, 5  ;;  %v220_v8 = vsel %vm219_vm0, %v169_v0, %v199_v3  ;;  %s1059_s11 = sld [smem:[#allocation5 + $0xb]]  ;;  %s188_s12 = scalar_lea.vmem [#allocation2], %s1046_s29 }
  0x55   :  { %v189_v9 = vld [vmem:[%s188_s12] sm:$0x1]  ;;  %v208_v10 = vrot.slane %v185_v6, 4  ;;  %v222_v11 = vsel %vm221_vm1, %v220_v8, %v202_v5  ;;  %s1063_s13 = sld [smem:[#allocation5 + $0xc]]  ;;  %s192_s14 = scalar_lea.vmem [#allocation2], %s1048_s30 }
  0x56   :  { %v193_v12 = vld [vmem:[%s192_s14] sm:$0x1]  ;;  %v211_v13 = vrot.slane %v189_v9, 3  ;;  %v224_v14 = vsel %vm223_vm2, %v222_v11, %v205_v7  ;;  %s1067_s15 = sld [smem:[#allocation5 + $0xd]]  ;;  %s196_s16 = scalar_lea.vmem [#allocation2], %s1050_s3 }
  0x57   :  { %v197_v15 = vld [vmem:[%s196_s16] sm:$0x1]  ;;  %v214_v16 = vrot.slane %v193_v12, 2  ;;  %v226_v17 = vsel %vm225_vm3, %v224_v14, %v208_v10  ;;  %s1071_s17 = sld [smem:[#allocation5 + $0xe]]  ;;  %s237_s18 = scalar_lea.vmem [#allocation2], %s1052_s5 }
  0x58   :  { %v217_v18 = vrot.slane %v197_v15, 1  ;;  %v228_v19 = vsel %vm227_vm4, %v226_v17, %v211_v13  ;;  %v238_v20 = vld [vmem:[%s237_s18] sm:$0x1]  ;;  %s1075_s0 = sld [smem:[#allocation5 + $0xf]]  ;;  %s241_s19 = scalar_lea.vmem [#allocation2], %s1054_s7 }
  0x59   :  { %v230_v21 = vsel %vm229_vm5, %v228_v19, %v214_v16  ;;  %v242_v22 = vld [vmem:[%s241_s19] sm:$0x1]  ;;  %s1079_s20 = sld [smem:[#allocation5 + $0x10]]  ;;  %s245_s21 = scalar_lea.vmem [#allocation2], %s1056_s9 }
  0x5a   :  { %v232_v23 = vsel %vm231_vm6, %v230_v21, %v217_v18  ;;  %v246_v24 = vld [vmem:[%s245_s21] sm:$0x1]  ;;  %v268_v25 = vrot.slane %v242_v22, 7  ;;  %s1083_s22 = sld [smem:[#allocation5 + $0x11]]  ;;  %s249_s25 = scalar_lea.vmem [#allocation2], %s1059_s11 }
  0x5b   :  { %234 = vst.msk [vmem:[%s1265_s2] sm:$0xff] %vm233_vm7, %v232_v23  ;;  %v250_v26 = vld [vmem:[%s249_s25] sm:$0x1]  ;;  %v271_v27 = vrot.slane %v246_v24, 6  ;;  %s253_s26 = scalar_lea.vmem [#allocation2], %s1063_s13  ;;  %s1092_s27 = sld [smem:[#allocation5 + $0x12]] }
  0x5c   :  { %v254_v28 = vld [vmem:[%s253_s26] sm:$0x1]  ;;  %v274_v29 = vrot.slane %v250_v26, 5  ;;  %v288_v30 = vsel %vm219_vm0, %v238_v20, %v268_v25  ;;  %s257_s28 = scalar_lea.vmem [#allocation2], %s1067_s15  ;;  %s766_s29 = sld [smem:[#allocation5 + $0x13]] }
  0x5d   :  { %v258_v31 = vld [vmem:[%s257_s28] sm:$0x1]  ;;  %v277_v32 = vrot.slane %v254_v28, 4  ;;  %v289_v33 = vsel %vm221_vm1, %v288_v30, %v271_v27  ;;  %s261_s30 = scalar_lea.vmem [#allocation2], %s1071_s17  ;;  %s767_s1 = sld [smem:[#allocation5 + $0x14]] }
  0x5e   :  { %v262_v34 = vld [vmem:[%s261_s30] sm:$0x1]  ;;  %v280_v35 = vrot.slane %v258_v31, 3  ;;  %v290_v36 = vsel %vm223_vm2, %v289_v33, %v274_v29  ;;  %s265_s3 = scalar_lea.vmem [#allocation2], %s1075_s0  ;;  %s768_s4 = sld [smem:[#allocation5 + $0x15]] }
  0x5f   :  { %v266_v37 = vld [vmem:[%s265_s3] sm:$0x1]  ;;  %v283_v38 = vrot.slane %v262_v34, 2  ;;  %v291_v39 = vsel %vm225_vm3, %v290_v36, %v277_v32  ;;  %s1101_s5 = sld [smem:[#allocation5 + $0x16]]  ;;  %s299_s6 = scalar_lea.vmem [#allocation2], %s1079_s20 }
  0x60   :  { %v286_v40 = vrot.slane %v266_v37, 1  ;;  %v292_v41 = vsel %vm227_vm4, %v291_v39, %v280_v35  ;;  %v300_v43 = vld [vmem:[%s299_s6] sm:$0x1]  ;;  %s303_s7 = scalar_lea.vmem [#allocation2], %s1083_s22  ;;  %s770_s8 = sld [smem:[#allocation5 + $0x17]] }
  0x61   :  { %v293_v42 = vsel %vm229_vm5, %v292_v41, %v283_v38  ;;  %v304_v44 = vld [vmem:[%s303_s7] sm:$0x1]  ;;  %s1107_s9 = sld [smem:[#allocation5 + $0x18]]  ;;  %s307_s12 = scalar_lea.vmem [#allocation2], %s1092_s27 }
  0x62   :  { %v294_v45 = vsel %vm231_vm6, %v293_v42, %v286_v40  ;;  %v330_v46 = vrot.slane %v304_v44, 7  ;;  %v308_v47 = vld [vmem:[%s307_s12] sm:$0x1]  ;;  %s1114_s13 = sld [smem:[#allocation5 + $0x19]]  ;;  %s311_s14 = scalar_lea.vmem [#allocation2], %s766_s29 }
  0x63   :  { %762 = vst.msk [vmem:[%s1265_s2 + $0x8] sm:$0xff] %vm233_vm7, %v294_v45  ;;  %v312_v48 = vld [vmem:[%s311_s14] sm:$0x1]  ;;  %v333_v49 = vrot.slane %v308_v47, 6  ;;  %s1117_s15 = sld [smem:[#allocation5 + $0x1a]]  ;;  %s315_s16 = scalar_lea.vmem [#allocation2], %s767_s1 }
  0x64   :  { %v350_v50 = vsel %vm219_vm0, %v300_v43, %v330_v46  ;;  %v316_v51 = vld [vmem:[%s315_s16] sm:$0x1]  ;;  %v336_v52 = vrot.slane %v312_v48, 5  ;;  %s1119_s17 = sld [smem:[#allocation5 + $0x1b]]  ;;  %s319_s18 = scalar_lea.vmem [#allocation2], %s768_s4 }
  0x65   :  { %v320_v53 = vld [vmem:[%s319_s18] sm:$0x1]  ;;  %v339_v54 = vrot.slane %v316_v51, 4  ;;  %v351_v55 = vsel %vm221_vm1, %v350_v50, %v333_v49  ;;  %s1122_s0 = sld [smem:[#allocation5 + $0x1c]]  ;;  %s323_s19 = scalar_lea.vmem [#allocation2], %s1101_s5 }
  0x66   :  { %v324_v56 = vld [vmem:[%s323_s19] sm:$0x1]  ;;  %v342_v57 = vrot.slane %v320_v53, 3  ;;  %v352_v58 = vsel %vm223_vm2, %v351_v55, %v336_v52  ;;  %s1126_s20 = sld [smem:[#allocation5 + $0x1d]]  ;;  %s327_s21 = scalar_lea.vmem [#allocation2], %s770_s8 }
  0x67   :  { %v328_v59 = vld [vmem:[%s327_s21] sm:$0x1]  ;;  %v345_v60 = vrot.slane %v324_v56, 2  ;;  %v353_v61 = vsel %vm225_vm3, %v352_v58, %v339_v54  ;;  %s1129_s22 = sld [smem:[#allocation5 + $0x1e]]  ;;  %s361_s23 = scalar_lea.vmem [#allocation2], %s1107_s9 }
  0x68   :  { %v348_v62 = vrot.slane %v328_v59, 1  ;;  %v354_v63 = vsel %vm227_vm4, %v353_v61, %v342_v57  ;;  %v362_v0 = vld [vmem:[%s361_s23] sm:$0x1]  ;;  %s1133_s24 = sld [smem:[#allocation5 + $0x1f]]  ;;  %s365_s25 = scalar_lea.vmem [#allocation2], %s1114_s13 }
  0x69   :  { %v355_v1 = vsel %vm229_vm5, %v354_v63, %v345_v60  ;;  %v366_v2 = vld [vmem:[%s365_s25] sm:$0x1]  ;;  %s1137_s26 = sld [smem:[#allocation5 + $0x20]]  ;;  %s369_s27 = scalar_lea.vmem [#allocation2], %s1117_s15 }
  0x6a   :  { %v356_v3 = vsel %vm231_vm6, %v355_v1, %v348_v62  ;;  %v370_v4 = vld [vmem:[%s369_s27] sm:$0x1]  ;;  %v392_v5 = vrot.slane %v366_v2, 7  ;;  %s1141_s28 = sld [smem:[#allocation5 + $0x21]]  ;;  %s373_s1 = scalar_lea.vmem [#allocation2], %s1119_s17 }
  0x6b   :  { %771 = vst.msk [vmem:[%s1265_s2 + $0x10] sm:$0xff] %vm233_vm7, %v356_v3  ;;  %v374_v6 = vld [vmem:[%s373_s1] sm:$0x1]  ;;  %v395_v7 = vrot.slane %v370_v4, 6  ;;  %s377_s3 = scalar_lea.vmem [#allocation2], %s1122_s0  ;;  %s1150_s4 = sld [smem:[#allocation5 + $0x22]] }
  0x6c   :  { %v378_v8 = vld [vmem:[%s377_s3] sm:$0x1]  ;;  %v398_v9 = vrot.slane %v374_v6, 5  ;;  %v412_v10 = vsel %vm219_vm0, %v362_v0, %v392_v5  ;;  %s381_s5 = scalar_lea.vmem [#allocation2], %s1126_s20  ;;  %s784_s6 = sld [smem:[#allocation5 + $0x23]] }
  0x6d   :  { %v382_v11 = vld [vmem:[%s381_s5] sm:$0x1]  ;;  %v401_v12 = vrot.slane %v378_v8, 4  ;;  %v413_v13 = vsel %vm221_vm1, %v412_v10, %v395_v7  ;;  %s385_s7 = scalar_lea.vmem [#allocation2], %s1129_s22  ;;  %s785_s8 = sld [smem:[#allocation5 + $0x24]] }
  0x6e   :  { %v386_v14 = vld [vmem:[%s385_s7] sm:$0x1]  ;;  %v404_v15 = vrot.slane %v382_v11, 3  ;;  %v414_v16 = vsel %vm223_vm2, %v413_v13, %v398_v9  ;;  %s389_s9 = scalar_lea.vmem [#allocation2], %s1133_s24  ;;  %s786_s10 = sld [smem:[#allocation5 + $0x25]] }
  0x6f   :  { %v390_v17 = vld [vmem:[%s389_s9] sm:$0x1]  ;;  %v407_v18 = vrot.slane %v386_v14, 2  ;;  %v415_v19 = vsel %vm225_vm3, %v414_v16, %v401_v12  ;;  %s1159_s11 = sld [smem:[#allocation5 + $0x26]]  ;;  %s423_s12 = scalar_lea.vmem [#allocation2], %s1137_s26 }
  0x70   :  { %v410_v20 = vrot.slane %v390_v17, 1  ;;  %v416_v21 = vsel %vm227_vm4, %v415_v19, %v404_v15  ;;  %v424_v23 = vld [vmem:[%s423_s12] sm:$0x1]  ;;  %s427_s13 = scalar_lea.vmem [#allocation2], %s1141_s28  ;;  %s788_s14 = sld [smem:[#allocation5 + $0x27]] }
  0x71   :  { %v417_v22 = vsel %vm229_vm5, %v416_v21, %v407_v18  ;;  %v428_v24 = vld [vmem:[%s427_s13] sm:$0x1]  ;;  %s1165_s15 = sld [smem:[#allocation5 + $0x28]]  ;;  %s431_s18 = scalar_lea.vmem [#allocation2], %s1150_s4 }
  0x72   :  { %v418_v25 = vsel %vm231_vm6, %v417_v22, %v410_v20  ;;  %v454_v26 = vrot.slane %v428_v24, 7  ;;  %v432_v27 = vld [vmem:[%s431_s18] sm:$0x1]  ;;  %s1172_s0 = sld [smem:[#allocation5 + $0x29]]  ;;  %s435_s19 = scalar_lea.vmem [#allocation2], %s784_s6 }
  0x73   :  { %780 = vst.msk [vmem:[%s1265_s2 + $0x18] sm:$0xff] %vm233_vm7, %v418_v25  ;;  %v436_v28 = vld [vmem:[%s435_s19] sm:$0x1]  ;;  %v457_v29 = vrot.slane %v432_v27, 6  ;;  %s1175_s20 = sld [smem:[#allocation5 + $0x2a]]  ;;  %s439_s21 = scalar_lea.vmem [#allocation2], %s785_s8 }
  0x74   :  { %v474_v30 = vsel %vm219_vm0, %v424_v23, %v454_v26  ;;  %v440_v31 = vld [vmem:[%s439_s21] sm:$0x1]  ;;  %v460_v32 = vrot.slane %v436_v28, 5  ;;  %s1177_s22 = sld [smem:[#allocation5 + $0x2b]]  ;;  %s443_s23 = scalar_lea.vmem [#allocation2], %s786_s10 }
  0x75   :  { %v444_v33 = vld [vmem:[%s443_s23] sm:$0x1]  ;;  %v463_v34 = vrot.slane %v440_v31, 4  ;;  %v475_v35 = vsel %vm221_vm1, %v474_v30, %v457_v29  ;;  %s1180_s24 = sld [smem:[#allocation5 + $0x2c]]  ;;  %s447_s25 = scalar_lea.vmem [#allocation2], %s1159_s11 }
  0x76   :  { %v448_v36 = vld [vmem:[%s447_s25] sm:$0x1]  ;;  %v466_v37 = vrot.slane %v444_v33, 3  ;;  %v476_v38 = vsel %vm223_vm2, %v475_v35, %v460_v32  ;;  %s1184_s26 = sld [smem:[#allocation5 + $0x2d]]  ;;  %s451_s27 = scalar_lea.vmem [#allocation2], %s788_s14 }
  0x77   :  { %v452_v39 = vld [vmem:[%s451_s27] sm:$0x1]  ;;  %v469_v40 = vrot.slane %v448_v36, 2  ;;  %v477_v41 = vsel %vm225_vm3, %v476_v38, %v463_v34  ;;  %s1187_s28 = sld [smem:[#allocation5 + $0x2e]]  ;;  %s485_s29 = scalar_lea.vmem [#allocation2], %s1165_s15 }
  0x78   :  { %v472_v42 = vrot.slane %v452_v39, 1  ;;  %v478_v43 = vsel %vm227_vm4, %v477_v41, %v466_v37  ;;  %v486_v44 = vld [vmem:[%s485_s29] sm:$0x1]  ;;  %s1191_s30 = sld [smem:[#allocation5 + $0x2f]]  ;;  %s489_s1 = scalar_lea.vmem [#allocation2], %s1172_s0 }
  0x79   :  { %v479_v45 = vsel %vm229_vm5, %v478_v43, %v469_v40  ;;  %v490_v46 = vld [vmem:[%s489_s1] sm:$0x1]  ;;  %s1195_s3 = sld [smem:[#allocation5 + $0x30]]  ;;  %s493_s4 = scalar_lea.vmem [#allocation2], %s1175_s20 }
  0x7a   :  { %v480_v47 = vsel %vm231_vm6, %v479_v45, %v472_v42  ;;  %v494_v48 = vld [vmem:[%s493_s4] sm:$0x1]  ;;  %v516_v49 = vrot.slane %v490_v46, 7  ;;  %s1199_s5 = sld [smem:[#allocation5 + $0x31]]  ;;  %s497_s8 = scalar_lea.vmem [#allocation2], %s1177_s22 }
  0x7b   :  { %789 = vst.msk [vmem:[%s1265_s2 + $0x20] sm:$0xff] %vm233_vm7, %v480_v47  ;;  %v498_v50 = vld [vmem:[%s497_s8] sm:$0x1]  ;;  %v519_v51 = vrot.slane %v494_v48, 6  ;;  %s501_s9 = scalar_lea.vmem [#allocation2], %s1180_s24  ;;  %s1208_s10 = sld [smem:[#allocation5 + $0x32]] }
  0x7c   :  { %v502_v52 = vld [vmem:[%s501_s9] sm:$0x1]  ;;  %v522_v53 = vrot.slane %v498_v50, 5  ;;  %v536_v54 = vsel %vm219_vm0, %v486_v44, %v516_v49  ;;  %s505_s11 = scalar_lea.vmem [#allocation2], %s1184_s26  ;;  %s802_s12 = sld [smem:[#allocation5 + $0x33]] }
  0x7d   :  { %v506_v55 = vld [vmem:[%s505_s11] sm:$0x1]  ;;  %v525_v56 = vrot.slane %v502_v52, 4  ;;  %v537_v57 = vsel %vm221_vm1, %v536_v54, %v519_v51  ;;  %s509_s13 = scalar_lea.vmem [#allocation2], %s1187_s28  ;;  %s803_s14 = sld [smem:[#allocation5 + $0x34]] }
  0x7e   :  { %v510_v58 = vld [vmem:[%s509_s13] sm:$0x1]  ;;  %v528_v59 = vrot.slane %v506_v55, 3  ;;  %v538_v60 = vsel %vm223_vm2, %v537_v57, %v522_v53  ;;  %s513_s15 = scalar_lea.vmem [#allocation2], %s1191_s30  ;;  %s804_s16 = sld [smem:[#allocation5 + $0x35]] }
  0x7f   :  { %v514_v61 = vld [vmem:[%s513_s15] sm:$0x1]  ;;  %v531_v62 = vrot.slane %v510_v58, 2  ;;  %v539_v63 = vsel %vm225_vm3, %v538_v60, %v525_v56  ;;  %s1217_s17 = sld [smem:[#allocation5 + $0x36]]  ;;  %s547_s18 = scalar_lea.vmem [#allocation2], %s1195_s3 }
  0x80   :  { %v534_v0 = vrot.slane %v514_v61, 1  ;;  %v540_v1 = vsel %vm227_vm4, %v539_v63, %v528_v59  ;;  %v548_v3 = vld [vmem:[%s547_s18] sm:$0x1]  ;;  %s551_s0 = scalar_lea.vmem [#allocation2], %s1199_s5  ;;  %s806_s19 = sld [smem:[#allocation5 + $0x37]] }
  0x81   :  { %v541_v2 = vsel %vm229_vm5, %v540_v1, %v531_v62  ;;  %v552_v4 = vld [vmem:[%s551_s0] sm:$0x1]  ;;  %s1223_s20 = sld [smem:[#allocation5 + $0x38]]  ;;  %s555_s23 = scalar_lea.vmem [#allocation2], %s1208_s10 }
  0x82   :  { %v542_v5 = vsel %vm231_vm6, %v541_v2, %v534_v0  ;;  %v578_v6 = vrot.slane %v552_v4, 7  ;;  %v556_v7 = vld [vmem:[%s555_s23] sm:$0x1]  ;;  %s1230_s24 = sld [smem:[#allocation5 + $0x39]]  ;;  %s559_s25 = scalar_lea.vmem [#allocation2], %s802_s12 }
  0x83   :  { %798 = vst.msk [vmem:[%s1265_s2 + $0x28] sm:$0xff] %vm233_vm7, %v542_v5  ;;  %v560_v8 = vld [vmem:[%s559_s25] sm:$0x1]  ;;  %v581_v9 = vrot.slane %v556_v7, 6  ;;  %s1233_s26 = sld [smem:[#allocation5 + $0x3a]]  ;;  %s563_s27 = scalar_lea.vmem [#allocation2], %s803_s14 }
  0x84   :  { %v598_v10 = vsel %vm219_vm0, %v548_v3, %v578_v6  ;;  %v564_v11 = vld [vmem:[%s563_s27] sm:$0x1]  ;;  %v584_v12 = vrot.slane %v560_v8, 5  ;;  %s1235_s28 = sld [smem:[#allocation5 + $0x3b]]  ;;  %s567_s29 = scalar_lea.vmem [#allocation2], %s804_s16 }
  0x85   :  { %v568_v13 = vld [vmem:[%s567_s29] sm:$0x1]  ;;  %v587_v14 = vrot.slane %v564_v11, 4  ;;  %v599_v15 = vsel %vm221_vm1, %v598_v10, %v581_v9  ;;  %s812_s30 = sld [smem:[#allocation5 + $0x3c]]  ;;  %s571_s1 = scalar_lea.vmem [#allocation2], %s1217_s17 }
  0x86   :  { %v572_v16 = vld [vmem:[%s571_s1] sm:$0x1]  ;;  %v590_v17 = vrot.slane %v568_v13, 3  ;;  %v600_v18 = vsel %vm223_vm2, %v599_v15, %v584_v12  ;;  %s813_s3 = sld [smem:[#allocation5 + $0x3d]]  ;;  %s575_s4 = scalar_lea.vmem [#allocation2], %s806_s19 }
  0x87   :  { %v576_v19 = vld [vmem:[%s575_s4] sm:$0x1]  ;;  %v593_v20 = vrot.slane %v572_v16, 2  ;;  %v601_v21 = vsel %vm225_vm3, %v600_v18, %v587_v14  ;;  %s814_s5 = sld [smem:[#allocation5 + $0x3e]]  ;;  %s609_s7 = scalar_lea.vmem [#allocation2], %s1223_s20 }
  0x88   :  { %v596_v22 = vrot.slane %v576_v19, 1  ;;  %v602_v23 = vsel %vm227_vm4, %v601_v21, %v590_v17  ;;  %s815_s6 = sld [smem:[#allocation5 + $0x3f]]  ;;  %v610_v25 = vld [vmem:[%s609_s7] sm:$0x1]  ;;  %s613_s8 = scalar_lea.vmem [#allocation2], %s1230_s24 }
  0x89   :  { %v603_v24 = vsel %vm229_vm5, %v602_v23, %v593_v20  ;;  %v614_v26 = vld [vmem:[%s613_s8] sm:$0x1]  ;;  %s617_s9 = scalar_lea.vmem [#allocation2], %s1233_s26 }
  0x8a   :  { %v604_v27 = vsel %vm231_vm6, %v603_v24, %v596_v22  ;;  %v618_v28 = vld [vmem:[%s617_s9] sm:$0x1]  ;;  %v640_v29 = vrot.slane %v614_v26, 7  ;;  %s621_s12 = scalar_lea.vmem [#allocation2], %s1235_s28 }
  0x8b   :  { %807 = vst.msk [vmem:[%s1265_s2 + $0x30] sm:$0xff] %vm233_vm7, %v604_v27  ;;  %v622_v30 = vld [vmem:[%s621_s12] sm:$0x1]  ;;  %v643_v31 = vrot.slane %v618_v28, 6  ;;  %s625_s13 = scalar_lea.vmem [#allocation2], %s812_s30 }
  0x8c   :  { %v626_v32 = vld [vmem:[%s625_s13] sm:$0x1]  ;;  %v646_v33 = vrot.slane %v622_v30, 5  ;;  %v660_v34 = vsel %vm219_vm0, %v610_v25, %v640_v29  ;;  %s629_s14 = scalar_lea.vmem [#allocation2], %s813_s3 }
  0x8d   :  { %v630_v35 = vld [vmem:[%s629_s14] sm:$0x1]  ;;  %v649_v36 = vrot.slane %v626_v32, 4  ;;  %v661_v37 = vsel %vm221_vm1, %v660_v34, %v643_v31  ;;  %s633_s15 = scalar_lea.vmem [#allocation2], %s814_s5 }
  0x8e   :  { %v634_v38 = vld [vmem:[%s633_s15] sm:$0x1]  ;;  %v652_v39 = vrot.slane %v630_v35, 3  ;;  %v662_v40 = vsel %vm223_vm2, %v661_v37, %v646_v33  ;;  %s637_s16 = scalar_lea.vmem [#allocation2], %s815_s6 }
  0x8f   :  { %v638_v41 = vld [vmem:[%s637_s16] sm:$0x1]  ;;  %v655_v42 = vrot.slane %v634_v38, 2  ;;  %v663_v43 = vsel %vm225_vm3, %v662_v40, %v649_v36 }
  0x90   :  { %v658_v44 = vrot.slane %v638_v41, 1  ;;  %v664_v45 = vsel %vm227_vm4, %v663_v43, %v652_v39 }
  0x91   :  { %v665_v46 = vsel %vm229_vm5, %v664_v45, %v655_v42 }
  0x92   :  { %v666_v47 = vsel %vm231_vm6, %v665_v46, %v658_v44 }
  0x93   :  { %816 = vst.msk [vmem:[%s1265_s2 + $0x38] sm:$0xff] %vm233_vm7, %v666_v47 }
  0x94   :  { %673 = vsyncmov [#allocation3] }
  0x97   :  { %s674_s0 = vpop.sfrf %673 }
  0x98   :  { %p817_p0 = scmp.ne.s32.totalorder %s674_s0, 0 }
  0x9a   :  { %678 = shalt.err (%p817_p0)  }

</bundles_post_ra>
